<compile_context>
chip_gen: v7x
topology: tpu7x:2x2x1
jax: 0.10.0
libtpu: 0.0.40
codegen_flags: <defaults>
</compile_context>

<pallas_src>
import math

import jax
import jax.numpy as jnp
from jax.experimental import pallas as pl
from jax.experimental.pallas import tpu as pltpu


def _prod(shape):
    r = 1
    for s in shape:
        r *= int(s)
    return r


# ----------------------------------------------------------------------------
# Kernel: one (batch element, layer) pair per grid step.
# ----------------------------------------------------------------------------
def _make_encoder_kernel(num_layers, nhead, head_dim, has_final_norm, compute_dtype):
    scale = 1.0 / math.sqrt(head_dim)

    def layer_norm(v, g, b):
        mu = jnp.mean(v, axis=-1, keepdims=True)
        var = jnp.mean((v - mu) * (v - mu), axis=-1, keepdims=True)
        return (v - mu) * jax.lax.rsqrt(var + 1e-5) * g + b

    def kernel(q_ref, k_ref, src_ref,
               wq_ref, bq_ref, wk_ref, bk_ref, wv_ref, bv_ref,
               wo_ref, bo_ref, w1_ref, b1_ref, w2_ref, b2_ref,
               g1_ref, be1_ref, g2_ref, be2_ref,
               *rest):
        if has_final_norm:
            gn_ref, bn_ref, out_ref, x_scr = rest
        else:
            out_ref, x_scr = rest

        l = pl.program_id(1)

        # Initialize the layer-carry from src at the first layer of this batch.
        @pl.when(l == 0)
        def _():
            x_scr[...] = src_ref[0].astype(jnp.float32)

        x = x_scr[...]                                # (S, E) running activation
        q_in = q_ref[0].astype(jnp.float32)           # (S, E)  same every layer
        k_in = k_ref[0].astype(jnp.float32)           # (S, E)

        def mm(a, b):
            return jnp.dot(a.astype(compute_dtype), b.astype(compute_dtype),
                           preferred_element_type=jnp.float32)

        # ---- fused, lane-dense QKV projections (contraction depth = E) ------
        q = mm(q_in, wq_ref[0]) + bq_ref[0]           # (S, E)
        k = mm(k_in, wk_ref[0]) + bk_ref[0]           # (S, E)
        v = mm(x,    wv_ref[0]) + bv_ref[0]           # (S, E)

        # ---- per-head attention on static lane slices (softmax in f32) ------
        ctx_heads = []
        for h in range(nhead):                        # static unroll, small H
            lo, hi = h * head_dim, (h + 1) * head_dim
            qh, kh, vh = q[:, lo:hi], k[:, lo:hi], v[:, lo:hi]
            # Q @ K^T without materializing a transpose.
            s = jax.lax.dot_general(qh, kh, (((1,), (1,)), ((), ())),
                                    preferred_element_type=jnp.float32) * scale
            s = s - jnp.max(s, axis=-1, keepdims=True)
            p = jnp.exp(s)
            p = p / jnp.sum(p, axis=-1, keepdims=True)
            ctx_heads.append(
                jnp.dot(p.astype(compute_dtype), vh.astype(compute_dtype),
                        preferred_element_type=jnp.float32))
        ctx = jnp.concatenate(ctx_heads, axis=-1)     # (S, E)

        # ---- single fused output projection ---------------------------------
        attn = mm(ctx, wo_ref[0]) + bo_ref[0]

        # ---- residual + LN1, feed-forward, residual + LN2 -------------------
        x1 = layer_norm(x + attn, g1_ref[0], be1_ref[0])
        ff = mm(x1, w1_ref[0]) + b1_ref[0]
        ff = jnp.maximum(ff, 0.0)
        ff = mm(ff, w2_ref[0]) + b2_ref[0]
        x2 = layer_norm(x1 + ff, g2_ref[0], be2_ref[0])

        x_scr[...] = x2                               # carry to next layer

        # Write the HBM output only once, after the last layer; fuse the
        # optional final LayerNorm here instead of a separate JAX pass.
        @pl.when(l == num_layers - 1)
        def _():
            y = x2
            if has_final_norm:
                y = layer_norm(y, gn_ref[...], bn_ref[...])
            out_ref[0] = y.astype(out_ref.dtype)

    return kernel


# ----------------------------------------------------------------------------
# Wrapper: stack per-layer params on a leading L axis and stream them layer
# by layer through VMEM via the grid's "arbitrary" axis.
# ----------------------------------------------------------------------------
def transformer_encoder_qkv(query, key, src, layer_params, nhead,
                            norm_params=None, compute_dtype=jnp.float32):
    """TransformerEncoder_QKV.forward fused into one pallas_call."""
    B, S, E = src.shape
    L = len(layer_params)
    assert E % nhead == 0
    dh = E // nhead

    names = ["wq", "bq", "wk", "bk", "wv", "bv", "wo", "bo",
             "w1", "b1", "w2", "b2", "g1", "be1", "g2", "be2"]
    # Stacked shapes: weights (L,E,E)/(L,E,FF)/(L,FF,E); biases/gains (L,1,E)/(L,1,FF).
    weights = [jnp.stack([p[n] for p in layer_params], axis=0) for n in names]

    data_spec = pl.BlockSpec((1, S, E), lambda b, l: (b, 0, 0))

    def per_layer_spec(arr):
        nz = arr.ndim - 1
        return pl.BlockSpec((1,) + tuple(arr.shape[1:]),
                            lambda b, l, nz=nz: (l,) + (0,) * nz)

    in_specs = [data_spec, data_spec, data_spec] + [per_layer_spec(w) for w in weights]
    args = [query, key, src] + weights

    has_final_norm = norm_params is not None
    if has_final_norm:
        gn = jnp.asarray(norm_params["g"], jnp.float32).reshape(1, E)
        bn = jnp.asarray(norm_params["b"], jnp.float32).reshape(1, E)
        args += [gn, bn]
        in_specs += [pl.BlockSpec((1, E), lambda b, l: (0, 0)),
                     pl.BlockSpec((1, E), lambda b, l: (0, 0))]

    # Explicit VMEM budget: double-buffered input blocks + output block + carry
    # scratch + headroom, clamped to [16 MiB, 64 MiB] (v7x physical per-TC VMEM).
    blk = 3 * S * E * query.dtype.itemsize
    blk += sum(_prod(w.shape[1:]) * w.dtype.itemsize for w in weights)
    if has_final_norm:
        blk += 2 * E * 4
    vmem_limit = 2 * blk + S * E * (src.dtype.itemsize + 4) + (8 << 20)
    vmem_limit = int(max(16 << 20, min(vmem_limit, 64 << 20)))

    kernel = _make_encoder_kernel(L, nhead, dh, has_final_norm, compute_dtype)

    return pl.pallas_call(
        kernel,
        out_shape=jax.ShapeDtypeStruct((B, S, E), src.dtype),
        grid_spec=pltpu.PrefetchScalarGridSpec(
            num_scalar_prefetch=0,
            grid=(B, L),                     # (parallel batch, arbitrary layer)
            in_specs=in_specs,
            out_specs=pl.BlockSpec((1, S, E), lambda b, l: (b, 0, 0)),
            scratch_shapes=[pltpu.VMEM((S, E), jnp.float32)],
        ),
        compiler_params=pltpu.CompilerParams(
            dimension_semantics=("parallel", "arbitrary"),
            vmem_limit_bytes=vmem_limit,
        ),
    )(*args)


# ----------------------------------------------------------------------------
# Pure-JAX reference (same math, un-fused).
# ----------------------------------------------------------------------------
def _ref_layer(query, key, src, p, nhead):
    q = query @ p["wq"] + p["bq"]
    k = key @ p["wk"] + p["bk"]
    v = src @ p["wv"] + p["bv"]
    B, S, E = src.shape
    dh = E // nhead
    qh = q.reshape(B, S, nhead, dh).transpose(0, 2, 1, 3)
    kh = k.reshape(B, S, nhead, dh).transpose(0, 2, 1, 3)
    vh = v.reshape(B, S, nhead, dh).transpose(0, 2, 1, 3)
    s = jnp.einsum("bhqd,bhkd->bhqk", qh, kh) / math.sqrt(dh)
    a = jax.nn.softmax(s, axis=-1)
    ctx = jnp.einsum("bhqk,bhkd->bhqd", a, vh).transpose(0, 2, 1, 3).reshape(B, S, E)
    attn_out = ctx @ p["wo"] + p["bo"]

    def ln(x, g, b):
        mu = jnp.mean(x, axis=-1, keepdims=True)
        var = jnp.mean((x - mu) ** 2, axis=-1, keepdims=True)
        return (x - mu) * jax.lax.rsqrt(var + 1e-5) * g + b

    x = ln(src + attn_out, p["g1"], p["be1"])
    ff = jnp.maximum(x @ p["w1"] + p["b1"], 0.0) @ p["w2"] + p["b2"]
    return ln(x + ff, p["g2"], p["be2"])


def _ref_encoder(query, key, src, layer_params, nhead, norm_params=None):
    out = src
    for p in layer_params:
        out = _ref_layer(query, key, out, p, nhead)
    if norm_params is not None:
        mu = jnp.mean(out, axis=-1, keepdims=True)
        var = jnp.mean((out - mu) ** 2, axis=-1, keepdims=True)
        out = (out - mu) * jax.lax.rsqrt(var + 1e-5) * norm_params["g"] + norm_params["b"]
    return out


# ----------------------------------------------------------------------------
# Deterministic parameter init + driver.
# ----------------------------------------------------------------------------
def _init_layer_params(rng, E, FF):
    keys = jax.random.split(rng, 8)
    s = 0.05
    return {
        "wq": jax.random.normal(keys[0], (E, E), jnp.float32) * s,
        "bq": jnp.zeros((1, E), jnp.float32),
        "wk": jax.random.normal(keys[1], (E, E), jnp.float32) * s,
        "bk": jnp.zeros((1, E), jnp.float32),
        "wv": jax.random.normal(keys[2], (E, E), jnp.float32) * s,
        "bv": jnp.zeros((1, E), jnp.float32),
        "wo": jax.random.normal(keys[3], (E, E), jnp.float32) * s,
        "bo": jax.random.normal(keys[4], (1, E), jnp.float32) * s,
        "w1": jax.random.normal(keys[5], (E, FF), jnp.float32) * s,
        "b1": jnp.zeros((1, FF), jnp.float32),
        "w2": jax.random.normal(keys[6], (FF, E), jnp.float32) * s,
        "b2": jax.random.normal(keys[7], (1, E), jnp.float32) * s,
        "g1": jnp.ones((1, E), jnp.float32),
        "be1": jnp.zeros((1, E), jnp.float32),
        "g2": jnp.ones((1, E), jnp.float32),
        "be2": jnp.zeros((1, E), jnp.float32),
    }


if __name__ == "__main__":
    B, S, E, H, FF, L = 2, 16, 32, 4, 64, 2   # batch, seq, d_model, nhead, dim_ff, layers
    root = jax.random.PRNGKey(0)
    kq, kk, ks, kp, kn = jax.random.split(root, 5)

    query = jax.random.normal(kq, (B, S, E), jnp.float32)
    key = jax.random.normal(kk, (B, S, E), jnp.float32)
    src = jax.random.normal(ks, (B, S, E), jnp.float32)
    layer_params = [_init_layer_params(k, E, FF) for k in jax.random.split(kp, L)]

    # Tolerance covers TPU default matmul precision (bf16-pass) differences
    # between the MXU dots in the kernel and the un-fused JAX reference.
    tol = dict(atol=5e-3, rtol=5e-3)

    # 1) norm=None (module default).
    out = transformer_encoder_qkv(query, key, src, layer_params, H)
    out = jax.block_until_ready(out)
    ref = _ref_encoder(query, key, src, layer_params, H)
    assert out.shape == (B, S, E)
    assert jnp.allclose(out, ref, **tol), "Pallas output mismatch (norm=None)"

    # 2) with a final LayerNorm fused into the last grid step via pl.when.
    kn1, kn2 = jax.random.split(kn)
    norm_params = {"g": 1.0 + 0.1 * jax.random.normal(kn1, (E,), jnp.float32),
                   "b": 0.1 * jax.random.normal(kn2, (E,), jnp.float32)}
    out_n = transformer_encoder_qkv(query, key, src, layer_params, H,
                                    norm_params=norm_params)
    out_n = jax.block_until_ready(out_n)
    ref_n = _ref_encoder(query, key, src, layer_params, H, norm_params=norm_params)
    assert jnp.allclose(out_n, ref_n, **tol), "Pallas output mismatch (final norm)"

    print("KERNEL_OK")
</pallas_src>

<mosaic_0001>
module attributes {stable_mosaic.version = 11 : i64} {
  func.func @kernel(%arg0: i32, %arg1: i32, %arg2: memref<1x16x32xf32, #tpu.memory_space<vmem>>, %arg3: memref<1x16x32xf32, #tpu.memory_space<vmem>>, %arg4: memref<1x16x32xf32, #tpu.memory_space<vmem>>, %arg5: memref<1x32x32xf32, #tpu.memory_space<vmem>>, %arg6: memref<1x1x32xf32, #tpu.memory_space<vmem>>, %arg7: memref<1x32x32xf32, #tpu.memory_space<vmem>>, %arg8: memref<1x1x32xf32, #tpu.memory_space<vmem>>, %arg9: memref<1x32x32xf32, #tpu.memory_space<vmem>>, %arg10: memref<1x1x32xf32, #tpu.memory_space<vmem>>, %arg11: memref<1x32x32xf32, #tpu.memory_space<vmem>>, %arg12: memref<1x1x32xf32, #tpu.memory_space<vmem>>, %arg13: memref<1x32x64xf32, #tpu.memory_space<vmem>>, %arg14: memref<1x1x64xf32, #tpu.memory_space<vmem>>, %arg15: memref<1x64x32xf32, #tpu.memory_space<vmem>>, %arg16: memref<1x1x32xf32, #tpu.memory_space<vmem>>, %arg17: memref<1x1x32xf32, #tpu.memory_space<vmem>>, %arg18: memref<1x1x32xf32, #tpu.memory_space<vmem>>, %arg19: memref<1x1x32xf32, #tpu.memory_space<vmem>>, %arg20: memref<1x1x32xf32, #tpu.memory_space<vmem>>, %arg21: memref<1x16x32xf32, #tpu.memory_space<vmem>>, %arg22: memref<16x32xf32, #tpu.memory_space<vmem>>) attributes {dimension_semantics = [#tpu.dimension_semantics<parallel>, #tpu.dimension_semantics<arbitrary>], iteration_bounds = array<i64: 2, 2>, scalar_prefetch = 0 : i64, scratch_operands = 1 : i64, tpu.core_type = #tpu.core_type<tc>, window_params = [{transform_indices = @transform_0, window_bounds = array<i64: 1, 16, 32>}, {transform_indices = @transform_1, window_bounds = array<i64: 1, 16, 32>}, {transform_indices = @transform_2, window_bounds = array<i64: 1, 16, 32>}, {transform_indices = @transform_3, window_bounds = array<i64: 1, 32, 32>}, {transform_indices = @transform_4, window_bounds = array<i64: 1, 1, 32>}, {transform_indices = @transform_5, window_bounds = array<i64: 1, 32, 32>}, {transform_indices = @transform_6, window_bounds = array<i64: 1, 1, 32>}, {transform_indices = @transform_7, window_bounds = array<i64: 1, 32, 32>}, {transform_indices = @transform_8, window_bounds = array<i64: 1, 1, 32>}, {transform_indices = @transform_9, window_bounds = array<i64: 1, 32, 32>}, {transform_indices = @transform_10, window_bounds = array<i64: 1, 1, 32>}, {transform_indices = @transform_11, window_bounds = array<i64: 1, 32, 64>}, {transform_indices = @transform_12, window_bounds = array<i64: 1, 1, 64>}, {transform_indices = @transform_13, window_bounds = array<i64: 1, 64, 32>}, {transform_indices = @transform_14, window_bounds = array<i64: 1, 1, 32>}, {transform_indices = @transform_15, window_bounds = array<i64: 1, 1, 32>}, {transform_indices = @transform_16, window_bounds = array<i64: 1, 1, 32>}, {transform_indices = @transform_17, window_bounds = array<i64: 1, 1, 32>}, {transform_indices = @transform_18, window_bounds = array<i64: 1, 1, 32>}, {transform_indices = @transform_19, window_bounds = array<i64: 1, 16, 32>}]} {
    %c0_i32 = arith.constant 0 : i32
    %0 = arith.cmpi eq, %arg1, %c0_i32 : i32
    %1 = arith.extui %0 : i1 to i32
    %c0_i32_0 = arith.constant 0 : i32
    %2 = arith.cmpi ne, %1, %c0_i32_0 : i32
    scf.if %2 {
      %c0_95 = arith.constant 0 : index
      %c0_96 = arith.constant 0 : index
      %c0_97 = arith.constant 0 : index
      %179 = vector.load %arg4[%c0_95, %c0_96, %c0_97] : memref<1x16x32xf32, #tpu.memory_space<vmem>>, vector<1x16x32xf32>
      %180 = vector.shape_cast %179 : vector<1x16x32xf32> to vector<16x32xf32>
      %c0_98 = arith.constant 0 : index
      %c0_99 = arith.constant 0 : index
      %181 = vector.load %arg22[%c0_98, %c0_99] : memref<16x32xf32, #tpu.memory_space<vmem>>, vector<16x32xf32>
      tpu.vector_store %arg22[%c0_98, %c0_99], %180 {strides = array<i32>} : memref<16x32xf32, #tpu.memory_space<vmem>>, vector<16x32xf32>,
    } else {
    }
    %c0 = arith.constant 0 : index
    %c0_1 = arith.constant 0 : index
    %3 = vector.load %arg22[%c0, %c0_1] : memref<16x32xf32, #tpu.memory_space<vmem>>, vector<16x32xf32>
    %c0_2 = arith.constant 0 : index
    %c0_3 = arith.constant 0 : index
    %c0_4 = arith.constant 0 : index
    %4 = vector.load %arg2[%c0_2, %c0_3, %c0_4] : memref<1x16x32xf32, #tpu.memory_space<vmem>>, vector<1x16x32xf32>
    %5 = vector.shape_cast %4 : vector<1x16x32xf32> to vector<16x32xf32>
    %c0_5 = arith.constant 0 : index
    %c0_6 = arith.constant 0 : index
    %c0_7 = arith.constant 0 : index
    %6 = vector.load %arg3[%c0_5, %c0_6, %c0_7] : memref<1x16x32xf32, #tpu.memory_space<vmem>>, vector<1x16x32xf32>
    %7 = vector.shape_cast %6 : vector<1x16x32xf32> to vector<16x32xf32>
    %c0_8 = arith.constant 0 : index
    %c0_9 = arith.constant 0 : index
    %c0_10 = arith.constant 0 : index
    %8 = vector.load %arg5[%c0_8, %c0_9, %c0_10] : memref<1x32x32xf32, #tpu.memory_space<vmem>>, vector<1x32x32xf32>
    %9 = vector.shape_cast %8 : vector<1x32x32xf32> to vector<32x32xf32>
    %cst = arith.constant dense<0.000000e+00> : vector<16x32xf32>
    %10 = tpu.matmul %5, %9, %cst {dimension_numbers = #tpu.dot_dimension_numbers<[1], [0], [0], [1], [0, 0, 1, 1], [], []>} : vector<16x32xf32>, vector<32x32xf32>, vector<16x32xf32> -> vector<16x32xf32>
    %c0_11 = arith.constant 0 : index
    %c0_12 = arith.constant 0 : index
    %c0_13 = arith.constant 0 : index
    %11 = vector.load %arg6[%c0_11, %c0_12, %c0_13] : memref<1x1x32xf32, #tpu.memory_space<vmem>>, vector<1x1x32xf32>
    %12 = vector.shape_cast %11 : vector<1x1x32xf32> to vector<1x32xf32>
    %13 = vector.broadcast %12 : vector<1x32xf32> to vector<16x32xf32>
    %14 = arith.addf %10, %13 : vector<16x32xf32>
    %c0_14 = arith.constant 0 : index
    %c0_15 = arith.constant 0 : index
    %c0_16 = arith.constant 0 : index
    %15 = vector.load %arg7[%c0_14, %c0_15, %c0_16] : memref<1x32x32xf32, #tpu.memory_space<vmem>>, vector<1x32x32xf32>
    %16 = vector.shape_cast %15 : vector<1x32x32xf32> to vector<32x32xf32>
    %cst_17 = arith.constant dense<0.000000e+00> : vector<16x32xf32>
    %17 = tpu.matmul %7, %16, %cst_17 {dimension_numbers = #tpu.dot_dimension_numbers<[1], [0], [0], [1], [0, 0, 1, 1], [], []>} : vector<16x32xf32>, vector<32x32xf32>, vector<16x32xf32> -> vector<16x32xf32>
    %c0_18 = arith.constant 0 : index
    %c0_19 = arith.constant 0 : index
    %c0_20 = arith.constant 0 : index
    %18 = vector.load %arg8[%c0_18, %c0_19, %c0_20] : memref<1x1x32xf32, #tpu.memory_space<vmem>>, vector<1x1x32xf32>
    %19 = vector.shape_cast %18 : vector<1x1x32xf32> to vector<1x32xf32>
    %20 = vector.broadcast %19 : vector<1x32xf32> to vector<16x32xf32>
    %21 = arith.addf %17, %20 : vector<16x32xf32>
    %c0_21 = arith.constant 0 : index
    %c0_22 = arith.constant 0 : index
    %c0_23 = arith.constant 0 : index
    %22 = vector.load %arg9[%c0_21, %c0_22, %c0_23] : memref<1x32x32xf32, #tpu.memory_space<vmem>>, vector<1x32x32xf32>
    %23 = vector.shape_cast %22 : vector<1x32x32xf32> to vector<32x32xf32>
    %cst_24 = arith.constant dense<0.000000e+00> : vector<16x32xf32>
    %24 = tpu.matmul %3, %23, %cst_24 {dimension_numbers = #tpu.dot_dimension_numbers<[1], [0], [0], [1], [0, 0, 1, 1], [], []>} : vector<16x32xf32>, vector<32x32xf32>, vector<16x32xf32> -> vector<16x32xf32>
    %c0_25 = arith.constant 0 : index
    %c0_26 = arith.constant 0 : index
    %c0_27 = arith.constant 0 : index
    %25 = vector.load %arg10[%c0_25, %c0_26, %c0_27] : memref<1x1x32xf32, #tpu.memory_space<vmem>>, vector<1x1x32xf32>
    %26 = vector.shape_cast %25 : vector<1x1x32xf32> to vector<1x32xf32>
    %27 = vector.broadcast %26 : vector<1x32xf32> to vector<16x32xf32>
    %28 = arith.addf %24, %27 : vector<16x32xf32>
    %29 = vector.extract_strided_slice %14 {offsets = [0, 0], sizes = [16, 8], strides = [1, 1]} : vector<16x32xf32> to vector<16x8xf32>
    %30 = vector.extract_strided_slice %21 {offsets = [0, 0], sizes = [16, 8], strides = [1, 1]} : vector<16x32xf32> to vector<16x8xf32>
    %31 = vector.extract_strided_slice %28 {offsets = [0, 0], sizes = [16, 8], strides = [1, 1]} : vector<16x32xf32> to vector<16x8xf32>
    %cst_28 = arith.constant dense<0.000000e+00> : vector<16x16xf32>
    %32 = tpu.matmul %29, %30, %cst_28 {dimension_numbers = #tpu.dot_dimension_numbers<[1], [1], [0], [0], [0, 0, 1, 0], [], []>} : vector<16x8xf32>, vector<16x8xf32>, vector<16x16xf32> -> vector<16x16xf32>
    %cst_29 = arith.constant 0.353553385 : f32
    %33 = vector.broadcast %cst_29 : f32 to vector<16x16xf32>
    %34 = arith.mulf %32, %33 : vector<16x16xf32>
    %cst_30 = arith.constant dense<0xFF800000> : vector<16xf32>
    %35 = vector.multi_reduction <maximumf>, %34, %cst_30 [1] : vector<16x16xf32> to vector<16xf32>
    %36 = vector.shape_cast %35 : vector<16xf32> to vector<16x1xf32>
    %37 = vector.broadcast %36 : vector<16x1xf32> to vector<16x16xf32>
    %38 = arith.subf %34, %37 : vector<16x16xf32>
    %39 = math.exp %38 : vector<16x16xf32>
    %cst_31 = arith.constant dense<0.000000e+00> : vector<16xf32>
    %40 = vector.multi_reduction <add>, %39, %cst_31 [1] : vector<16x16xf32> to vector<16xf32>
    %41 = vector.shape_cast %40 : vector<16xf32> to vector<16x1xf32>
    %42 = vector.broadcast %41 : vector<16x1xf32> to vector<16x16xf32>
    %43 = arith.divf %39, %42 : vector<16x16xf32>
    %cst_32 = arith.constant dense<0.000000e+00> : vector<16x8xf32>
    %44 = tpu.matmul %43, %31, %cst_32 {dimension_numbers = #tpu.dot_dimension_numbers<[1], [0], [0], [1], [0, 0, 1, 1], [], []>} : vector<16x16xf32>, vector<16x8xf32>, vector<16x8xf32> -> vector<16x8xf32>
    %45 = vector.extract_strided_slice %14 {offsets = [0, 8], sizes = [16, 8], strides = [1, 1]} : vector<16x32xf32> to vector<16x8xf32>
    %46 = vector.extract_strided_slice %21 {offsets = [0, 8], sizes = [16, 8], strides = [1, 1]} : vector<16x32xf32> to vector<16x8xf32>
    %47 = vector.extract_strided_slice %28 {offsets = [0, 8], sizes = [16, 8], strides = [1, 1]} : vector<16x32xf32> to vector<16x8xf32>
    %cst_33 = arith.constant dense<0.000000e+00> : vector<16x16xf32>
    %48 = tpu.matmul %45, %46, %cst_33 {dimension_numbers = #tpu.dot_dimension_numbers<[1], [1], [0], [0], [0, 0, 1, 0], [], []>} : vector<16x8xf32>, vector<16x8xf32>, vector<16x16xf32> -> vector<16x16xf32>
    %cst_34 = arith.constant 0.353553385 : f32
    %49 = vector.broadcast %cst_34 : f32 to vector<16x16xf32>
    %50 = arith.mulf %48, %49 : vector<16x16xf32>
    %cst_35 = arith.constant dense<0xFF800000> : vector<16xf32>
    %51 = vector.multi_reduction <maximumf>, %50, %cst_35 [1] : vector<16x16xf32> to vector<16xf32>
    %52 = vector.shape_cast %51 : vector<16xf32> to vector<16x1xf32>
    %53 = vector.broadcast %52 : vector<16x1xf32> to vector<16x16xf32>
    %54 = arith.subf %50, %53 : vector<16x16xf32>
    %55 = math.exp %54 : vector<16x16xf32>
    %cst_36 = arith.constant dense<0.000000e+00> : vector<16xf32>
    %56 = vector.multi_reduction <add>, %55, %cst_36 [1] : vector<16x16xf32> to vector<16xf32>
    %57 = vector.shape_cast %56 : vector<16xf32> to vector<16x1xf32>
    %58 = vector.broadcast %57 : vector<16x1xf32> to vector<16x16xf32>
    %59 = arith.divf %55, %58 : vector<16x16xf32>
    %cst_37 = arith.constant dense<0.000000e+00> : vector<16x8xf32>
    %60 = tpu.matmul %59, %47, %cst_37 {dimension_numbers = #tpu.dot_dimension_numbers<[1], [0], [0], [1], [0, 0, 1, 1], [], []>} : vector<16x16xf32>, vector<16x8xf32>, vector<16x8xf32> -> vector<16x8xf32>
    %61 = vector.extract_strided_slice %14 {offsets = [0, 16], sizes = [16, 8], strides = [1, 1]} : vector<16x32xf32> to vector<16x8xf32>
    %62 = vector.extract_strided_slice %21 {offsets = [0, 16], sizes = [16, 8], strides = [1, 1]} : vector<16x32xf32> to vector<16x8xf32>
    %63 = vector.extract_strided_slice %28 {offsets = [0, 16], sizes = [16, 8], strides = [1, 1]} : vector<16x32xf32> to vector<16x8xf32>
    %cst_38 = arith.constant dense<0.000000e+00> : vector<16x16xf32>
    %64 = tpu.matmul %61, %62, %cst_38 {dimension_numbers = #tpu.dot_dimension_numbers<[1], [1], [0], [0], [0, 0, 1, 0], [], []>} : vector<16x8xf32>, vector<16x8xf32>, vector<16x16xf32> -> vector<16x16xf32>
    %cst_39 = arith.constant 0.353553385 : f32
    %65 = vector.broadcast %cst_39 : f32 to vector<16x16xf32>
    %66 = arith.mulf %64, %65 : vector<16x16xf32>
    %cst_40 = arith.constant dense<0xFF800000> : vector<16xf32>
    %67 = vector.multi_reduction <maximumf>, %66, %cst_40 [1] : vector<16x16xf32> to vector<16xf32>
    %68 = vector.shape_cast %67 : vector<16xf32> to vector<16x1xf32>
    %69 = vector.broadcast %68 : vector<16x1xf32> to vector<16x16xf32>
    %70 = arith.subf %66, %69 : vector<16x16xf32>
    %71 = math.exp %70 : vector<16x16xf32>
    %cst_41 = arith.constant dense<0.000000e+00> : vector<16xf32>
    %72 = vector.multi_reduction <add>, %71, %cst_41 [1] : vector<16x16xf32> to vector<16xf32>
    %73 = vector.shape_cast %72 : vector<16xf32> to vector<16x1xf32>
    %74 = vector.broadcast %73 : vector<16x1xf32> to vector<16x16xf32>
    %75 = arith.divf %71, %74 : vector<16x16xf32>
    %cst_42 = arith.constant dense<0.000000e+00> : vector<16x8xf32>
    %76 = tpu.matmul %75, %63, %cst_42 {dimension_numbers = #tpu.dot_dimension_numbers<[1], [0], [0], [1], [0, 0, 1, 1], [], []>} : vector<16x16xf32>, vector<16x8xf32>, vector<16x8xf32> -> vector<16x8xf32>
    %77 = vector.extract_strided_slice %14 {offsets = [0, 24], sizes = [16, 8], strides = [1, 1]} : vector<16x32xf32> to vector<16x8xf32>
    %78 = vector.extract_strided_slice %21 {offsets = [0, 24], sizes = [16, 8], strides = [1, 1]} : vector<16x32xf32> to vector<16x8xf32>
    %79 = vector.extract_strided_slice %28 {offsets = [0, 24], sizes = [16, 8], strides = [1, 1]} : vector<16x32xf32> to vector<16x8xf32>
    %cst_43 = arith.constant dense<0.000000e+00> : vector<16x16xf32>
    %80 = tpu.matmul %77, %78, %cst_43 {dimension_numbers = #tpu.dot_dimension_numbers<[1], [1], [0], [0], [0, 0, 1, 0], [], []>} : vector<16x8xf32>, vector<16x8xf32>, vector<16x16xf32> -> vector<16x16xf32>
    %cst_44 = arith.constant 0.353553385 : f32
    %81 = vector.broadcast %cst_44 : f32 to vector<16x16xf32>
    %82 = arith.mulf %80, %81 : vector<16x16xf32>
    %cst_45 = arith.constant dense<0xFF800000> : vector<16xf32>
    %83 = vector.multi_reduction <maximumf>, %82, %cst_45 [1] : vector<16x16xf32> to vector<16xf32>
    %84 = vector.shape_cast %83 : vector<16xf32> to vector<16x1xf32>
    %85 = vector.broadcast %84 : vector<16x1xf32> to vector<16x16xf32>
    %86 = arith.subf %82, %85 : vector<16x16xf32>
    %87 = math.exp %86 : vector<16x16xf32>
    %cst_46 = arith.constant dense<0.000000e+00> : vector<16xf32>
    %88 = vector.multi_reduction <add>, %87, %cst_46 [1] : vector<16x16xf32> to vector<16xf32>
    %89 = vector.shape_cast %88 : vector<16xf32> to vector<16x1xf32>
    %90 = vector.broadcast %89 : vector<16x1xf32> to vector<16x16xf32>
    %91 = arith.divf %87, %90 : vector<16x16xf32>
    %cst_47 = arith.constant dense<0.000000e+00> : vector<16x8xf32>
    %92 = tpu.matmul %91, %79, %cst_47 {dimension_numbers = #tpu.dot_dimension_numbers<[1], [0], [0], [1], [0, 0, 1, 1], [], []>} : vector<16x16xf32>, vector<16x8xf32>, vector<16x8xf32> -> vector<16x8xf32>
    %93 = tpu.concatenate %44, %60, %76, %92 in 1 : vector<16x8xf32>, vector<16x8xf32>, vector<16x8xf32>, vector<16x8xf32> -> vector<16x32xf32>
    %c0_48 = arith.constant 0 : index
    %c0_49 = arith.constant 0 : index
    %c0_50 = arith.constant 0 : index
    %94 = vector.load %arg11[%c0_48, %c0_49, %c0_50] : memref<1x32x32xf32, #tpu.memory_space<vmem>>, vector<1x32x32xf32>
    %95 = vector.shape_cast %94 : vector<1x32x32xf32> to vector<32x32xf32>
    %cst_51 = arith.constant dense<0.000000e+00> : vector<16x32xf32>
    %96 = tpu.matmul %93, %95, %cst_51 {dimension_numbers = #tpu.dot_dimension_numbers<[1], [0], [0], [1], [0, 0, 1, 1], [], []>} : vector<16x32xf32>, vector<32x32xf32>, vector<16x32xf32> -> vector<16x32xf32>
    %c0_52 = arith.constant 0 : index
    %c0_53 = arith.constant 0 : index
    %c0_54 = arith.constant 0 : index
    %97 = vector.load %arg12[%c0_52, %c0_53, %c0_54] : memref<1x1x32xf32, #tpu.memory_space<vmem>>, vector<1x1x32xf32>
    %98 = vector.shape_cast %97 : vector<1x1x32xf32> to vector<1x32xf32>
    %99 = vector.broadcast %98 : vector<1x32xf32> to vector<16x32xf32>
    %100 = arith.addf %96, %99 : vector<16x32xf32>
    %101 = arith.addf %3, %100 : vector<16x32xf32>
    %c0_55 = arith.constant 0 : index
    %c0_56 = arith.constant 0 : index
    %c0_57 = arith.constant 0 : index
    %102 = vector.load %arg17[%c0_55, %c0_56, %c0_57] : memref<1x1x32xf32, #tpu.memory_space<vmem>>, vector<1x1x32xf32>
    %103 = vector.shape_cast %102 : vector<1x1x32xf32> to vector<1x32xf32>
    %c0_58 = arith.constant 0 : index
    %c0_59 = arith.constant 0 : index
    %c0_60 = arith.constant 0 : index
    %104 = vector.load %arg18[%c0_58, %c0_59, %c0_60] : memref<1x1x32xf32, #tpu.memory_space<vmem>>, vector<1x1x32xf32>
    %105 = vector.shape_cast %104 : vector<1x1x32xf32> to vector<1x32xf32>
    %cst_61 = arith.constant dense<0.000000e+00> : vector<16xf32>
    %106 = vector.multi_reduction <add>, %101, %cst_61 [1] : vector<16x32xf32> to vector<16xf32>
    %107 = vector.shape_cast %106 : vector<16xf32> to vector<16x1xf32>
    %cst_62 = arith.constant 3.200000e+01 : f32
    %108 = vector.broadcast %cst_62 : f32 to vector<16x1xf32>
    %109 = arith.divf %107, %108 : vector<16x1xf32>
    %110 = vector.broadcast %109 : vector<16x1xf32> to vector<16x32xf32>
    %111 = arith.subf %101, %110 : vector<16x32xf32>
    %112 = vector.broadcast %109 : vector<16x1xf32> to vector<16x32xf32>
    %113 = arith.subf %101, %112 : vector<16x32xf32>
    %114 = arith.mulf %111, %113 : vector<16x32xf32>
    %cst_63 = arith.constant dense<0.000000e+00> : vector<16xf32>
    %115 = vector.multi_reduction <add>, %114, %cst_63 [1] : vector<16x32xf32> to vector<16xf32>
    %116 = vector.shape_cast %115 : vector<16xf32> to vector<16x1xf32>
    %cst_64 = arith.constant 3.200000e+01 : f32
    %117 = vector.broadcast %cst_64 : f32 to vector<16x1xf32>
    %118 = arith.divf %116, %117 : vector<16x1xf32>
    %119 = vector.broadcast %109 : vector<16x1xf32> to vector<16x32xf32>
    %120 = arith.subf %101, %119 : vector<16x32xf32>
    %cst_65 = arith.constant 9.99999974E-6 : f32
    %121 = vector.broadcast %cst_65 : f32 to vector<16x1xf32>
    %122 = arith.addf %118, %121 : vector<16x1xf32>
    %123 = math.rsqrt %122 : vector<16x1xf32>
    %124 = vector.broadcast %123 : vector<16x1xf32> to vector<16x32xf32>
    %125 = arith.mulf %120, %124 : vector<16x32xf32>
    %126 = vector.broadcast %103 : vector<1x32xf32> to vector<16x32xf32>
    %127 = arith.mulf %125, %126 : vector<16x32xf32>
    %128 = vector.broadcast %105 : vector<1x32xf32> to vector<16x32xf32>
    %129 = arith.addf %127, %128 : vector<16x32xf32>
    %c0_66 = arith.constant 0 : index
    %c0_67 = arith.constant 0 : index
    %c0_68 = arith.constant 0 : index
    %130 = vector.load %arg13[%c0_66, %c0_67, %c0_68] : memref<1x32x64xf32, #tpu.memory_space<vmem>>, vector<1x32x64xf32>
    %131 = vector.shape_cast %130 : vector<1x32x64xf32> to vector<32x64xf32>
    %cst_69 = arith.constant dense<0.000000e+00> : vector<16x64xf32>
    %132 = tpu.matmul %129, %131, %cst_69 {dimension_numbers = #tpu.dot_dimension_numbers<[1], [0], [0], [1], [0, 0, 1, 1], [], []>} : vector<16x32xf32>, vector<32x64xf32>, vector<16x64xf32> -> vector<16x64xf32>
    %c0_70 = arith.constant 0 : index
    %c0_71 = arith.constant 0 : index
    %c0_72 = arith.constant 0 : index
    %133 = vector.load %arg14[%c0_70, %c0_71, %c0_72] : memref<1x1x64xf32, #tpu.memory_space<vmem>>, vector<1x1x64xf32>
    %134 = vector.shape_cast %133 : vector<1x1x64xf32> to vector<1x64xf32>
    %135 = vector.broadcast %134 : vector<1x64xf32> to vector<16x64xf32>
    %136 = arith.addf %132, %135 : vector<16x64xf32>
    %cst_73 = arith.constant 0.000000e+00 : f32
    %137 = vector.broadcast %cst_73 : f32 to vector<16x64xf32>
    %138 = arith.maximumf %136, %137 : vector<16x64xf32>
    %c0_74 = arith.constant 0 : index
    %c0_75 = arith.constant 0 : index
    %c0_76 = arith.constant 0 : index
    %139 = vector.load %arg15[%c0_74, %c0_75, %c0_76] : memref<1x64x32xf32, #tpu.memory_space<vmem>>, vector<1x64x32xf32>
    %140 = vector.shape_cast %139 : vector<1x64x32xf32> to vector<64x32xf32>
    %cst_77 = arith.constant dense<0.000000e+00> : vector<16x32xf32>
    %141 = tpu.matmul %138, %140, %cst_77 {dimension_numbers = #tpu.dot_dimension_numbers<[1], [0], [0], [1], [0, 0, 1, 1], [], []>} : vector<16x64xf32>, vector<64x32xf32>, vector<16x32xf32> -> vector<16x32xf32>
    %c0_78 = arith.constant 0 : index
    %c0_79 = arith.constant 0 : index
    %c0_80 = arith.constant 0 : index
    %142 = vector.load %arg16[%c0_78, %c0_79, %c0_80] : memref<1x1x32xf32, #tpu.memory_space<vmem>>, vector<1x1x32xf32>
    %143 = vector.shape_cast %142 : vector<1x1x32xf32> to vector<1x32xf32>
    %144 = vector.broadcast %143 : vector<1x32xf32> to vector<16x32xf32>
    %145 = arith.addf %141, %144 : vector<16x32xf32>
    %146 = arith.addf %129, %145 : vector<16x32xf32>
    %c0_81 = arith.constant 0 : index
    %c0_82 = arith.constant 0 : index
    %c0_83 = arith.constant 0 : index
    %147 = vector.load %arg19[%c0_81, %c0_82, %c0_83] : memref<1x1x32xf32, #tpu.memory_space<vmem>>, vector<1x1x32xf32>
    %148 = vector.shape_cast %147 : vector<1x1x32xf32> to vector<1x32xf32>
    %c0_84 = arith.constant 0 : index
    %c0_85 = arith.constant 0 : index
    %c0_86 = arith.constant 0 : index
    %149 = vector.load %arg20[%c0_84, %c0_85, %c0_86] : memref<1x1x32xf32, #tpu.memory_space<vmem>>, vector<1x1x32xf32>
    %150 = vector.shape_cast %149 : vector<1x1x32xf32> to vector<1x32xf32>
    %cst_87 = arith.constant dense<0.000000e+00> : vector<16xf32>
    %151 = vector.multi_reduction <add>, %146, %cst_87 [1] : vector<16x32xf32> to vector<16xf32>
    %152 = vector.shape_cast %151 : vector<16xf32> to vector<16x1xf32>
    %cst_88 = arith.constant 3.200000e+01 : f32
    %153 = vector.broadcast %cst_88 : f32 to vector<16x1xf32>
    %154 = arith.divf %152, %153 : vector<16x1xf32>
    %155 = vector.broadcast %154 : vector<16x1xf32> to vector<16x32xf32>
    %156 = arith.subf %146, %155 : vector<16x32xf32>
    %157 = vector.broadcast %154 : vector<16x1xf32> to vector<16x32xf32>
    %158 = arith.subf %146, %157 : vector<16x32xf32>
    %159 = arith.mulf %156, %158 : vector<16x32xf32>
    %cst_89 = arith.constant dense<0.000000e+00> : vector<16xf32>
    %160 = vector.multi_reduction <add>, %159, %cst_89 [1] : vector<16x32xf32> to vector<16xf32>
    %161 = vector.shape_cast %160 : vector<16xf32> to vector<16x1xf32>
    %cst_90 = arith.constant 3.200000e+01 : f32
    %162 = vector.broadcast %cst_90 : f32 to vector<16x1xf32>
    %163 = arith.divf %161, %162 : vector<16x1xf32>
    %164 = vector.broadcast %154 : vector<16x1xf32> to vector<16x32xf32>
    %165 = arith.subf %146, %164 : vector<16x32xf32>
    %cst_91 = arith.constant 9.99999974E-6 : f32
    %166 = vector.broadcast %cst_91 : f32 to vector<16x1xf32>
    %167 = arith.addf %163, %166 : vector<16x1xf32>
    %168 = math.rsqrt %167 : vector<16x1xf32>
    %169 = vector.broadcast %168 : vector<16x1xf32> to vector<16x32xf32>
    %170 = arith.mulf %165, %169 : vector<16x32xf32>
    %171 = vector.broadcast %148 : vector<1x32xf32> to vector<16x32xf32>
    %172 = arith.mulf %170, %171 : vector<16x32xf32>
    %173 = vector.broadcast %150 : vector<1x32xf32> to vector<16x32xf32>
    %174 = arith.addf %172, %173 : vector<16x32xf32>
    %c0_92 = arith.constant 0 : index
    %c0_93 = arith.constant 0 : index
    %175 = vector.load %arg22[%c0_92, %c0_93] : memref<16x32xf32, #tpu.memory_space<vmem>>, vector<16x32xf32>
    tpu.vector_store %arg22[%c0_92, %c0_93], %174 {strides = array<i32>} : memref<16x32xf32, #tpu.memory_space<vmem>>, vector<16x32xf32>,
    %c1_i32 = arith.constant 1 : i32
    %176 = arith.cmpi eq, %arg1, %c1_i32 : i32
    %177 = arith.extui %176 : i1 to i32
    %c0_i32_94 = arith.constant 0 : i32
    %178 = arith.cmpi ne, %177, %c0_i32_94 : i32
    scf.if %178 {
      %c0_95 = arith.constant 0 : index
      %c0_96 = arith.constant 0 : index
      %c0_97 = arith.constant 0 : index
      %179 = vector.load %arg21[%c0_95, %c0_96, %c0_97] : memref<1x16x32xf32, #tpu.memory_space<vmem>>, vector<1x16x32xf32>
      %180 = vector.shape_cast %179 : vector<1x16x32xf32> to vector<16x32xf32>
      %181 = vector.shape_cast %174 : vector<16x32xf32> to vector<1x16x32xf32>
      tpu.vector_store %arg21[%c0_95, %c0_96, %c0_97], %181 {strides = array<i32>} : memref<1x16x32xf32, #tpu.memory_space<vmem>>, vector<1x16x32xf32>,
    } else {
    }
    return
  }
  func.func @transform_0(%arg0: i32, %arg1: i32) -> (i32, i32, i32) {
    %c0_i32 = arith.constant 0 : i32
    %c0_i32_0 = arith.constant 0 : i32
    %c0_i32_1 = arith.constant 0 : i32
    return %arg0, %c0_i32, %c0_i32_0 : i32, i32, i32
  }
  func.func @transform_1(%arg0: i32, %arg1: i32) -> (i32, i32, i32) {
    %c0_i32 = arith.constant 0 : i32
    %c0_i32_0 = arith.constant 0 : i32
    %c0_i32_1 = arith.constant 0 : i32
    return %arg0, %c0_i32, %c0_i32_0 : i32, i32, i32
  }
  func.func @transform_2(%arg0: i32, %arg1: i32) -> (i32, i32, i32) {
    %c0_i32 = arith.constant 0 : i32
    %c0_i32_0 = arith.constant 0 : i32
    %c0_i32_1 = arith.constant 0 : i32
    return %arg0, %c0_i32, %c0_i32_0 : i32, i32, i32
  }
  func.func @transform_3(%arg0: i32, %arg1: i32) -> (i32, i32, i32) {
    %c0_i32 = arith.constant 0 : i32
    %c0_i32_0 = arith.constant 0 : i32
    %c0_i32_1 = arith.constant 0 : i32
    return %arg1, %c0_i32, %c0_i32_0 : i32, i32, i32
  }
  func.func @transform_4(%arg0: i32, %arg1: i32) -> (i32, i32, i32) {
    %c0_i32 = arith.constant 0 : i32
    %c0_i32_0 = arith.constant 0 : i32
    %c0_i32_1 = arith.constant 0 : i32
    return %arg1, %c0_i32, %c0_i32_0 : i32, i32, i32
  }
  func.func @transform_5(%arg0: i32, %arg1: i32) -> (i32, i32, i32) {
    %c0_i32 = arith.constant 0 : i32
    %c0_i32_0 = arith.constant 0 : i32
    %c0_i32_1 = arith.constant 0 : i32
    return %arg1, %c0_i32, %c0_i32_0 : i32, i32, i32
  }
  func.func @transform_6(%arg0: i32, %arg1: i32) -> (i32, i32, i32) {
    %c0_i32 = arith.constant 0 : i32
    %c0_i32_0 = arith.constant 0 : i32
    %c0_i32_1 = arith.constant 0 : i32
    return %arg1, %c0_i32, %c0_i32_0 : i32, i32, i32
  }
  func.func @transform_7(%arg0: i32, %arg1: i32) -> (i32, i32, i32) {
    %c0_i32 = arith.constant 0 : i32
    %c0_i32_0 = arith.constant 0 : i32
    %c0_i32_1 = arith.constant 0 : i32
    return %arg1, %c0_i32, %c0_i32_0 : i32, i32, i32
  }
  func.func @transform_8(%arg0: i32, %arg1: i32) -> (i32, i32, i32) {
    %c0_i32 = arith.constant 0 : i32
    %c0_i32_0 = arith.constant 0 : i32
    %c0_i32_1 = arith.constant 0 : i32
    return %arg1, %c0_i32, %c0_i32_0 : i32, i32, i32
  }
  func.func @transform_9(%arg0: i32, %arg1: i32) -> (i32, i32, i32) {
    %c0_i32 = arith.constant 0 : i32
    %c0_i32_0 = arith.constant 0 : i32
    %c0_i32_1 = arith.constant 0 : i32
    return %arg1, %c0_i32, %c0_i32_0 : i32, i32, i32
  }
  func.func @transform_10(%arg0: i32, %arg1: i32) -> (i32, i32, i32) {
    %c0_i32 = arith.constant 0 : i32
    %c0_i32_0 = arith.constant 0 : i32
    %c0_i32_1 = arith.constant 0 : i32
    return %arg1, %c0_i32, %c0_i32_0 : i32, i32, i32
  }
  func.func @transform_11(%arg0: i32, %arg1: i32) -> (i32, i32, i32) {
    %c0_i32 = arith.constant 0 : i32
    %c0_i32_0 = arith.constant 0 : i32
    %c0_i32_1 = arith.constant 0 : i32
    return %arg1, %c0_i32, %c0_i32_0 : i32, i32, i32
  }
  func.func @transform_12(%arg0: i32, %arg1: i32) -> (i32, i32, i32) {
    %c0_i32 = arith.constant 0 : i32
    %c0_i32_0 = arith.constant 0 : i32
    %c0_i32_1 = arith.constant 0 : i32
    return %arg1, %c0_i32, %c0_i32_0 : i32, i32, i32
  }
  func.func @transform_13(%arg0: i32, %arg1: i32) -> (i32, i32, i32) {
    %c0_i32 = arith.constant 0 : i32
    %c0_i32_0 = arith.constant 0 : i32
    %c0_i32_1 = arith.constant 0 : i32
    return %arg1, %c0_i32, %c0_i32_0 : i32, i32, i32
  }
  func.func @transform_14(%arg0: i32, %arg1: i32) -> (i32, i32, i32) {
    %c0_i32 = arith.constant 0 : i32
    %c0_i32_0 = arith.constant 0 : i32
    %c0_i32_1 = arith.constant 0 : i32
    return %arg1, %c0_i32, %c0_i32_0 : i32, i32, i32
  }
  func.func @transform_15(%arg0: i32, %arg1: i32) -> (i32, i32, i32) {
    %c0_i32 = arith.constant 0 : i32
    %c0_i32_0 = arith.constant 0 : i32
    %c0_i32_1 = arith.constant 0 : i32
    return %arg1, %c0_i32, %c0_i32_0 : i32, i32, i32
  }
  func.func @transform_16(%arg0: i32, %arg1: i32) -> (i32, i32, i32) {
    %c0_i32 = arith.constant 0 : i32
    %c0_i32_0 = arith.constant 0 : i32
    %c0_i32_1 = arith.constant 0 : i32
    return %arg1, %c0_i32, %c0_i32_0 : i32, i32, i32
  }
  func.func @transform_17(%arg0: i32, %arg1: i32) -> (i32, i32, i32) {
    %c0_i32 = arith.constant 0 : i32
    %c0_i32_0 = arith.constant 0 : i32
    %c0_i32_1 = arith.constant 0 : i32
    return %arg1, %c0_i32, %c0_i32_0 : i32, i32, i32
  }
  func.func @transform_18(%arg0: i32, %arg1: i32) -> (i32, i32, i32) {
    %c0_i32 = arith.constant 0 : i32
    %c0_i32_0 = arith.constant 0 : i32
    %c0_i32_1 = arith.constant 0 : i32
    return %arg1, %c0_i32, %c0_i32_0 : i32, i32, i32
  }
  func.func @transform_19(%arg0: i32, %arg1: i32) -> (i32, i32, i32) {
    %c0_i32 = arith.constant 0 : i32
    %c0_i32_0 = arith.constant 0 : i32
    %c0_i32_1 = arith.constant 0 : i32
    return %arg0, %c0_i32, %c0_i32_0 : i32, i32, i32
  }
}

</mosaic_0001>

<bundles_post_ra>
// kernel: tpu_custom_call.1
= control target key start
LH: loop header
LB: loop body
LE: loop exit
PB: predicated region body
PF: predicated region fallthrough
CT: control target
= control target key end

     0   :  { %s4566_s0 = inlined_call_operand.hbm [shape: f32[2,16,32], index: 0, kind: input, shape index: {}]   ;;  %s4567_s1 = inlined_call_operand.hbm [shape: f32[2,16,32], index: 1, kind: input, shape index: {}]   ;;  %s4568_s2 = inlined_call_operand.hbm [shape: f32[2,16,32], index: 2, kind: input, shape index: {}]   ;;  %s4569_s3 = inlined_call_operand.vmem [shape: f32[2,32,32], index: 3, kind: input, shape index: {}]   ;;  %s4570_s4 = inlined_call_operand.vmem [shape: f32[2,1,32], index: 4, kind: input, shape index: {}]   ;;  %s4571_s5 = inlined_call_operand.vmem [shape: f32[2,32,32], index: 5, kind: input, shape index: {}]   ;;  %s4572_s6 = inlined_call_operand.vmem [shape: f32[2,1,32], index: 6, kind: input, shape index: {}]   ;;  %s4573_s7 = inlined_call_operand.vmem [shape: f32[2,32,32], index: 7, kind: input, shape index: {}]   ;;  %s4574_s8 = inlined_call_operand.vmem [shape: f32[2,1,32], index: 8, kind: input, shape index: {}]   ;;  %s4575_s9 = inlined_call_operand.hbm [shape: f32[2,32,32], index: 9, kind: input, shape index: {}]   ;;  %s4576_s10 = inlined_call_operand.vmem [shape: f32[2,1,32], index: 10, kind: input, shape index: {}]   ;;  %s4577_s11 = inlined_call_operand.hbm [shape: f32[2,32,64], index: 11, kind: input, shape index: {}]   ;;  %s4578_s12 = inlined_call_operand.vmem [shape: f32[2,1,64], index: 12, kind: input, shape index: {}]   ;;  %s4579_s13 = inlined_call_operand.vmem [shape: f32[2,64,32], index: 13, kind: input, shape index: {}]   ;;  %s4580_s14 = inlined_call_operand.vmem [shape: f32[2,1,32], index: 14, kind: input, shape index: {}]   ;;  %s4581_s15 = inlined_call_operand.vmem [shape: f32[2,1,32], index: 15, kind: input, shape index: {}]   ;;  %s4582_s16 = inlined_call_operand.vmem [shape: f32[2,1,32], index: 16, kind: input, shape index: {}]   ;;  %s4583_s17 = inlined_call_operand.vmem [shape: f32[2,1,32], index: 17, kind: input, shape index: {}]   ;;  %s4584_s18 = inlined_call_operand.vmem [shape: f32[2,1,32], index: 18, kind: input, shape index: {}]   ;;  %s4585_s19 = inlined_call_operand.hbm [shape: f32[2,16,32], index: 19, kind: output, shape index: {}]  }
   0x1   :  { %4629 = sst [smem:[#allocation35_spill]] %s4566_s0 }
   0x2   :  { %4630 = sst [smem:[#allocation36_spill]] %s4567_s1 }
   0x3   :  { %4631 = sst [smem:[#allocation37_spill]] %s4568_s2 }
   0x4   :  { %4632 = sst [smem:[#allocation38_spill]] %s4569_s3 }
   0x5   :  { %4633 = sst [smem:[#allocation39_spill]] %s4570_s4 }
   0x6   :  { %4634 = sst [smem:[#allocation40_spill]] %s4571_s5 }
   0x7   :  { %4635 = sst [smem:[#allocation41_spill]] %s4572_s6 }
   0x8   :  { %4636 = sst [smem:[#allocation42_spill]] %s4573_s7 }
   0x9   :  { %4637 = sst [smem:[#allocation43_spill]] %s4574_s8 }
   0xa   :  { %4638 = sst [smem:[#allocation44_spill]] %s4575_s9 }
   0xb   :  { %4639 = sst [smem:[#allocation45_spill]] %s4576_s10 }
   0xc   :  { %4640 = sst [smem:[#allocation46_spill]] %s4577_s11 }
   0xd   :  { %4641 = sst [smem:[#allocation47_spill]] %s4578_s12 }
   0xe   :  { %4642 = sst [smem:[#allocation48_spill]] %s4579_s13 }
   0xf   :  { %4643 = sst [smem:[#allocation49_spill]] %s4580_s14 }
  0x10   :  { %4644 = sst [smem:[#allocation50_spill]] %s4581_s15 }
  0x11   :  { %4645 = sst [smem:[#allocation51_spill]] %s4582_s16 }
  0x12   :  { %4646 = sst [smem:[#allocation52_spill]] %s4583_s17 }
  0x13   :  { %4647 = sst [smem:[#allocation53_spill]] %s4584_s18 }
  0x14   :  { %4648 = sst [smem:[#allocation54_spill]] %s4585_s19 }
  0x15   :  { %24 = vsyncpa [#allocation4], 0 }
  0x16   :  { %26 = vsyncpa [#allocation4 + $0x1], 0 }
  0x17   :  { %27 = vsyncpa [#allocation7], 0 }
  0x18   :  { %29 = vsyncpa [#allocation7 + $0x1], 0 }
  0x19   :  { %30 = vsyncpa [#allocation10], 0 }
  0x1a   :  { %32 = vsyncpa [#allocation10 + $0x1], 0 }
  0x1b   :  { %33 = vsyncpa [#allocation5], 0 }
  0x1c   :  { %35 = vsyncpa [#allocation5 + $0x1], 0  ;;  %s3831_s0 = smov 0   ;;  %s3833_s30 = smov 0  }
  0x1d   :  { %s3835_s20 = smov 0   ;;  %s3837_s21 = smov 0  }
  0x1e   :  { %s3839_s1 = smov 0   ;;  %s3841_s22 = smov 0  }
  0x1f   :  { %s3843_s2 = smov 0   ;;  %s3845_s23 = smov 0  }
  0x20   :  { %s3847_s24 = smov 0   ;;  %s3849_s25 = smov 0  }
  0x21   :  { %s3851_s3 = smov 0  }
  0x22 LB: > { %4649 = sst [smem:[#allocation17_spill]] %s3678_s30  ;;  %s3887_s26 = sadd.s32 4294967295, %s3714_s3   ;;  %s3714_s3 = sphi %s3851_s3, %s41_s3   ;;  %s3710_s25 = sphi %s3849_s25, %s4756_s25   ;;  %s3706_s24 = sphi %s3847_s24, %s4755_s24   ;;  %s3702_s23 = sphi %s3845_s23, %s4754_s23   ;;  %s3698_s2 = sphi %s3843_s2, %s4753_s2   ;;  %s3694_s22 = sphi %s3841_s22, %s4752_s22   ;;  %s3690_s1 = sphi %s3839_s1, %s4751_s1   ;;  %s3686_s21 = sphi %s3837_s21, %s4750_s21   ;;  %s3682_s20 = sphi %s3835_s20, %s4749_s20   ;;  %s3678_s30 = sphi %s3833_s30, %s4748_s30   ;;  %s3674_s0 = sphi %s3831_s0, %s4747_s0  }
  0x23   : > { %4650 = sst [smem:[#allocation18_spill]] %s3682_s20  ;;  %s2839_s27 = sadd.s32 4294967294, %s3714_s3  }
  0x24   : > { %4651 = sst [smem:[#allocation19_spill]] %s3686_s21  ;;  %p67_p0 = scmp.ne.s32.totalorder %s3694_s22, %s3690_s1 }
  0x25   : > { %4652 = sst [smem:[#allocation20_spill]] %s3690_s1  ;;  %p4597_p1 = scmp.eq.s32.totalorder %s3714_s3, 0 }
  0x26   : > { %4653 = sst [smem:[#allocation21_spill]] %s3694_s22  ;;  %p73_p2 = scmp.ne.s32.totalorder %s3690_s1, %s3686_s21 }
  0x27   : > { %4654 = sst [smem:[#allocation22_spill]] %s3698_s2  ;;  %p4596_p3 = scmp.eq.s32.totalorder %s3887_s26, 0 }
  0x28   : > { %4655 = sst [smem:[#allocation23_spill]] %s3702_s23  ;;  %p69_p4 = por %p4597_p1, %p67_p0 }
  0x29   : > { %4656 = sst [smem:[#allocation24_spill]] %s3706_s24  ;;  %p565_p5 = scmp.eq.s32.totalorder %s3887_s26, 3 }
  0x2a   : > { %4657 = sst [smem:[#allocation25_spill]] %s3710_s25  ;;  %p3903_p6 = por %p4596_p3, %p73_p2 }
  0x2b   : > { %4658 = sst [smem:[#allocation26_spill]] %s3714_s3  ;;  %p571_p7 = scmp.eq.s32.totalorder %s2839_s27, 3 }
  0x2c   : > { %s4659_s19 = scalar_select %p3903_p6, 1, 0 }
  0x2d   : > { %p3907_p8 = por %p565_p5, %p67_p0  ;;  %p3911_p9 = por %p571_p7, %p73_p2 }
  0x2e   : > { %p4595_p10 = scmp.lt.s32.totalorder %s3714_s3, 4  ;;  %s4594_s21 = sand.u32 1, %s3694_s22  }
  0x2f   : > { %s4660_s28 = scalar_select %p3907_p8, 1, 0 }
  0x30   : > { %s4662_s29 = scalar_select %p3911_p9, 1, 0 }
  0x31   : > { %4661 = sst [smem:[#allocation27_spill]] %s4660_s28  ;;  %s3918_s23 = sshll.u32 %s3710_s25, 8 }
  0x32   : > { %4663 = sst [smem:[#allocation28_spill]] %s4662_s29  ;;  %s3922_s18 = sshll.u32 %s4594_s21, 4 }
  0x33   : > { %p3926_p11 = pnand %p4595_p10, %p69_p4  ;;  %s4598_s28 = sand.u32 1, %s3714_s3  }
  0x34   : > { %s4665_s15 = sld [smem:[#allocation36_spill]]  ;;  %s616_s14 = scalar_lea.vmem [#allocation6], %s3922_s18 }
  0x35   : > { %s4664_s27 = scalar_select %p3926_p11, 1, 0 }
  0x36   : > { %s623_s21 = sshll.u32 %s616_s14, 4  ;;  %s3943_s13 = scalar_lea.sflag [#allocation7], %s4598_s28  ;;  %s3938_s21 = int_to_ptr.vmem [resolvable:$true] %s623_s21 }
  0x37   : > { %p3949_p0 = pneg %p3926_p11 }
  0x3a   : > { %s3935_s29 = scalar_lea.hbm %s4665_s15, %s3918_s23  ;;  %s3439_s14 = scalar_lea.hbm %s4665_s15, 512 }
  0x3b   : > { %s3434_s12 = scalar_lea.hbm %s3935_s29, 256  ;;  %p3440_p5 = scmp.lt.u32.totalorder %s3935_s29, %s4665_s15 }
  0x3c   : > { %p3435_p13 = scmp.ne.s32.totalorder %s3935_s29, %s3434_s12  ;;  %p3441_p7 = scmp.lt.u32.totalorder %s3439_s14, %s3434_s12 }
  0x3d   : > { %p3443_p3 = scmp.lt.u32.totalorder %s3434_s12, %s3935_s29 }
  0x3e   : > { %p3437_p2 = pnand %p3949_p0, %p3435_p13  ;;  %p3442_p10 = por %p3441_p7, %p3440_p5 }
  0x40   : > { %p3438_p4 = pneg %p3437_p2  ;;  %p3444_p1 = por %p3443_p3, %p3442_p10 }
  0x42   : > { %p3445_p12 = pnand %p3444_p1, %p3438_p4 }
  0x44   : > { %3448 = shalt.err (!%p3445_p12)
}
  0x45   : > { %s3449_s28 = scalar_lea.vmem %s3938_s21, 256  ;;  %s3716_s16 = smov [#allocation6]  }
  0x46   : > { %p3450_p13 = scmp.ne.s32.totalorder %s3938_s21, %s3449_s28  ;;  %s3454_s17 = sshll.u32 %s3716_s16, 4  ;;  %s3455_s17 = int_to_ptr.vmem [resolvable:$false] %s3454_s17 }
  0x47   : > { %s3456_s7 = scalar_lea.vmem %s3455_s17, 512  ;;  %p3457_p8 = scmp.lt.s32.totalorder %s3938_s21, %s3455_s17 }
  0x48   : > { %p3452_p2 = pnand %p3450_p13, %p3949_p0  ;;  %p3458_p6 = scmp.lt.s32.totalorder %s3456_s7, %s3449_s28 }
  0x4a   : > { %p3453_p9 = pneg %p3452_p2  ;;  %p3459_p5 = por %p3458_p6, %p3457_p8 }
  0x4c   : > { %p3460_p7 = pnand %p3459_p5, %p3453_p9 }
  0x4e   : > { %3463 = shalt.err (!%p3460_p7)
}
  0x4f   : > { %s4601_s8 = smov 128   ;;  %s4603_s12 = smov 8  }
  0x50   : > { %3251 = dma.hbm_to_vmem [thread:$0]  (!%p3926_p11), %s3935_s29, 256, %s3938_s21, %s3943_s13, %s4601_s8, %s4601_s8, %s4603_s12  }
  0x51   : > { %p786_p1 = scmp.lt.s32.totalorder %s3714_s3, 5  ;;  %p4667_p3 = scmp.ge.s32.totalorder %s3714_s3, 1 }
  0x52   : > { %s50_s14 = sadd.s32 1, %s3706_s24  ;;  %s294_s16 = sadd.s32 1, %s3682_s20 }
  0x53   : > { %p3979_p6 = pnand %p4667_p3, %p786_p1  ;;  %p51_p8 = scmp.ge.s32.totalorder %s50_s14, 2 }
  0x54   : > { %p301_p9 = scmp.ne.s32.totalorder %s3682_s20, %s3678_s30  ;;  %p307_p10 = scmp.ne.s32.totalorder %s3678_s30, %s3674_s0 }
  0x55   : > { %s4668_s28 = scalar_select %p3979_p6, 1, 0 }
  0x56   : > { %s4758_s14 = smov (%p51_p8, %s50_s14), 0  ;;  %s4670_s17 = sadd.s32 1, %s3710_s25 }
  0x57   : > { %4669 = sst [smem:[#allocation29_spill]] %s4758_s14  ;;  %s4760_s17 = smov (!%p51_p8, %s4670_s17), %s3710_s25 }
  0x58   : > { %s291_s21 = ssub.s32 %s3706_s24, %s4758_s14  ;;  %p4671_p12 = scmp.eq.s32.totalorder %s3714_s3, 0 }
  0x59   : > { %p55_p13 = scmp.ge.s32.totalorder %s4760_s17, 2  ;;  %p292_p2 = scmp.eq.s32.totalorder %s291_s21, 0 }
  0x5a   : > { %p3998_p4 = por %p301_p9, %p4671_p12  ;;  %p4673_p5 = scmp.eq.s32.totalorder %s3887_s26, 0 }
  0x5b   : > { %s698_s7 = sand.u32 1, %s3682_s20   ;;  %s4762_s17 = smov (%p55_p13, %s4760_s17), 0 }
  0x5c   : > { %p4004_p7 = por %p307_p10, %p4673_p5  ;;  %4676 = sst [smem:[#allocation31_spill]] %s4762_s17 }
  0x5d   : > { %s4012_s8 = scalar_select %p292_p2, %s3682_s20, %s294_s16  }
  0x5e   : > { %s4674_s0 = scalar_select %p4004_p7, 1, 0 }
  0x5f   : > { %4677 = sst [smem:[#allocation32_spill]] %s4012_s8  ;;  %s57_s12 = ssub.s32 %s3710_s25, %s4762_s17 }
  0x60   : > { %4675 = sst [smem:[#allocation30_spill]] %s4674_s0  ;;  %s2851_s15 = sshll.u32 %s698_s7, 5 }
  0x61   : > { %p58_p1 = scmp.eq.s32.totalorder %s57_s12, 0  ;;  %s2928_s14 = sshll.u32 %s3706_s24, 9 }
  0x62   : > { %s700_s6 = scalar_lea.vmem [#allocation9], %s2851_s15  ;;  %s4678_s4 = sadd.s32 1, %s3694_s22 }
  0x63   : > { %s707_s5 = sshll.u32 %s700_s6, 4  ;;  %s4680_s9 = sld [smem:[#allocation44_spill]]  ;;  %s4027_s5 = int_to_ptr.vmem [resolvable:$true] %s707_s5 }
  0x64   : > { %s4020_s21 = scalar_select %p58_p1, %s3694_s22, %s4678_s4  }
  0x65   : > { %p4681_p3 = scmp.lt.s32.totalorder %s3714_s3, 4  ;;  %s4683_s11 = sld [smem:[#allocation46_spill]] }
  0x66   : > { %4679 = sst [smem:[#allocation33_spill]] %s4020_s21  ;;  %s727_s2 = scalar_lea.vmem [#allocation11], %s2851_s15 }
  0x67   : > { %p4033_p8 = pnand %p4681_p3, %p3998_p4  ;;  %s734_s16 = sshll.u32 %s727_s2, 4  ;;  %s4042_s16 = int_to_ptr.vmem [resolvable:$true] %s734_s16 }
  0x68   : > { %s4684_s7 = sand.u32 1, %s3714_s3  }
  0x69   : > { %s4025_s0 = scalar_lea.hbm %s4680_s9, %s2928_s14  ;;  %s4046_s17 = scalar_lea.sflag [#allocation10], %s4684_s7 }
  0x6a   : > { %s4682_s12 = scalar_select %p4033_p8, 1, 0 }
  0x6b   : > { %s4040_s30 = scalar_lea.hbm %s4683_s11, %s2928_s14  ;;  %s3464_s29 = scalar_lea.hbm %s4025_s0, 512 }
  0x6c   : > { %p3465_p9 = scmp.ne.s32.totalorder %s4025_s0, %s3464_s29  ;;  %p4617_p10 = pneg %p4033_p8 }
  0x6d   : > { %s3469_s14 = scalar_lea.hbm %s4680_s9, 1024  ;;  %p3470_p13 = scmp.lt.u32.totalorder %s4025_s0, %s4680_s9 }
  0x6e   : > { %p3467_p12 = pnand %p4617_p10, %p3465_p9  ;;  %p3471_p2 = scmp.lt.u32.totalorder %s3469_s14, %s3464_s29 }
  0x6f   : > { %p3473_p1 = scmp.lt.u32.totalorder %s3464_s29, %s4025_s0 }
  0x70   : > { %p3468_p4 = pneg %p3467_p12  ;;  %p3472_p5 = por %p3471_p2, %p3470_p13 }
  0x72   : > { %p3474_p3 = por %p3473_p1, %p3472_p5 }
  0x74   : > { %p3475_p7 = pnand %p3474_p3, %p3468_p4 }
  0x76   : > { %3478 = shalt.err (!%p3475_p7)
}
  0x77   : > { %s3479_s2 = scalar_lea.vmem %s4027_s5, 512  ;;  %s3719_s7 = smov [#allocation9]  }
  0x78   : > { %p3480_p9 = scmp.ne.s32.totalorder %s4027_s5, %s3479_s2  ;;  %s3484_s6 = sshll.u32 %s3719_s7, 4  ;;  %s3485_s6 = int_to_ptr.vmem [resolvable:$false] %s3484_s6 }
  0x79   : > { %s3486_s25 = scalar_lea.vmem %s3485_s6, 1024  ;;  %p3487_p11 = scmp.lt.s32.totalorder %s4027_s5, %s3485_s6 }
  0x7a   : > { %p3482_p12 = pnand %p3480_p9, %p4617_p10  ;;  %p3488_p13 = scmp.lt.s32.totalorder %s3486_s25, %s3479_s2 }
  0x7c   : > { %p3483_p6 = pneg %p3482_p12  ;;  %p3489_p2 = por %p3488_p13, %p3487_p11 }
  0x7e   : > { %p3490_p5 = pnand %p3489_p2, %p3483_p6 }
  0x80   : > { %3493 = shalt.err (!%p3490_p5)
}
  0x81   : > { %s4685_s29 = smov 8   ;;  %s4686_s4 = smov 128  }
  0x82   : > { %3257 = dma.hbm_to_vmem [thread:$0]  (!%p4033_p8), %s4025_s0, 512, %s4027_s5, %s4046_s17, %s4686_s4, %s4686_s4, %s4685_s29  }
  0x83   : > { %s4687_s7 = sld [smem:[#allocation35_spill]]  ;;  %s595_s6 = scalar_lea.vmem [#allocation3], %s3922_s18 }
  0x84   : > { %s602_s25 = sshll.u32 %s595_s6, 4  ;;  %s4688_s9 = sand.u32 1, %s3694_s22   ;;  %s4084_s25 = int_to_ptr.vmem [resolvable:$true] %s602_s25 }
  0x85   : > { %s4088_s24 = scalar_lea.sflag [#allocation4], %s4688_s9 }
  0x89   : > { %s4081_s2 = scalar_lea.hbm %s4687_s7, %s3918_s23  ;;  %s3499_s14 = scalar_lea.hbm %s4687_s7, 512 }
  0x8a   : > { %s3494_s21 = scalar_lea.hbm %s4081_s2, 256  ;;  %p3500_p4 = scmp.lt.u32.totalorder %s4081_s2, %s4687_s7 }
  0x8b   : > { %p3495_p11 = scmp.ne.s32.totalorder %s4081_s2, %s3494_s21  ;;  %p3501_p1 = scmp.lt.u32.totalorder %s3499_s14, %s3494_s21 }
  0x8c   : > { %p3503_p9 = scmp.lt.u32.totalorder %s3494_s21, %s4081_s2 }
  0x8d   : > { %p3497_p6 = pnand %p3495_p11, %p3949_p0  ;;  %p3502_p3 = por %p3501_p1, %p3500_p4 }
  0x8f   : > { %p3498_p7 = pneg %p3497_p6  ;;  %p3504_p12 = por %p3503_p9, %p3502_p3 }
  0x91   : > { %p3505_p13 = pnand %p3504_p12, %p3498_p7 }
  0x93   : > { %3508 = shalt.err (!%p3505_p13)
}
  0x94   : > { %s3509_s9 = scalar_lea.vmem %s4084_s25, 256  ;;  %s3720_s6 = smov [#allocation3]  }
  0x95   : > { %p3510_p2 = scmp.ne.s32.totalorder %s4084_s25, %s3509_s9  ;;  %s3514_s5 = sshll.u32 %s3720_s6, 4  ;;  %s3515_s5 = int_to_ptr.vmem [resolvable:$false] %s3514_s5 }
  0x96   : > { %s3516_s8 = scalar_lea.vmem %s3515_s5, 512  ;;  %p3517_p6 = scmp.lt.s32.totalorder %s4084_s25, %s3515_s5 }
  0x97   : > { %p3512_p5 = pnand %p3510_p2, %p3949_p0  ;;  %p3518_p10 = scmp.lt.s32.totalorder %s3516_s8, %s3509_s9 }
  0x99   : > { %p3513_p11 = pneg %p3512_p5  ;;  %p3519_p4 = por %p3518_p10, %p3517_p6 }
  0x9b   : > { %p3520_p1 = pnand %p3519_p4, %p3513_p11 }
  0x9d   : > { %3523 = shalt.err (!%p3520_p1)
}
  0x9e   : > { %p4689_p7 = scmp.ne.s32.totalorder %s4664_s27, 0  ;;  %s4690_s14 = sld [smem:[#allocation37_spill]] }
  0x9f   : > { %s637_s9 = scalar_lea.vmem [#allocation8], %s3922_s18 }
  0xa0   : > { %3248 = dma.hbm_to_vmem [thread:$0]  (!%p4689_p7), %s4081_s2, 256, %s4084_s25, %s4088_s24, %s4686_s4, %s4686_s4, %s4685_s29  }
  0xa1   : > { %s644_s6 = sshll.u32 %s637_s9, 4  ;;  %s4122_s6 = int_to_ptr.vmem [resolvable:$true] %s644_s6 }
  0xa4   : > { %s4119_s15 = scalar_lea.hbm %s4690_s14, %s3918_s23  ;;  %s3529_s2 = scalar_lea.hbm %s4690_s14, 512 }
  0xa5   : > { %s3524_s5 = scalar_lea.hbm %s4119_s15, 256  ;;  %p3530_p12 = scmp.lt.u32.totalorder %s4119_s15, %s4690_s14 }
  0xa6   : > { %p3525_p10 = scmp.ne.s32.totalorder %s4119_s15, %s3524_s5  ;;  %p3531_p13 = scmp.lt.u32.totalorder %s3529_s2, %s3524_s5 }
  0xa7   : > { %p3533_p5 = scmp.lt.u32.totalorder %s3524_s5, %s4119_s15 }
  0xa8   : > { %p3527_p3 = pnand %p3525_p10, %p3949_p0  ;;  %p3532_p2 = por %p3531_p13, %p3530_p12 }
  0xaa   : > { %p3528_p9 = pneg %p3527_p3  ;;  %p3534_p11 = por %p3533_p5, %p3532_p2 }
  0xac   : > { %p3535_p6 = pnand %p3534_p11, %p3528_p9 }
  0xae   : > { %3538 = shalt.err (!%p3535_p6)
}
  0xaf   : > { %s3539_s18 = scalar_lea.vmem %s4122_s6, 256  ;;  %s3721_s21 = smov [#allocation8]  }
  0xb0   : > { %p3540_p4 = scmp.ne.s32.totalorder %s4122_s6, %s3539_s18  ;;  %s3544_s0 = sshll.u32 %s3721_s21, 4  ;;  %s3545_s0 = int_to_ptr.vmem [resolvable:$false] %s3544_s0 }
  0xb1   : > { %s3546_s9 = scalar_lea.vmem %s3545_s0, 512  ;;  %p3547_p3 = scmp.lt.s32.totalorder %s4122_s6, %s3545_s0 }
  0xb2   : > { %p3542_p1 = pnand %p3540_p4, %p3949_p0  ;;  %p3548_p8 = scmp.lt.s32.totalorder %s3546_s9, %s3539_s18 }
  0xb4   : > { %p3543_p10 = pneg %p3542_p1  ;;  %p3549_p12 = por %p3548_p8, %p3547_p3 }
  0xb6   : > { %p3550_p13 = pnand %p3549_p12, %p3543_p10 }
  0xb8   : > { %3553 = shalt.err (!%p3550_p13)
}
  0xb9   : > { %3254 = dma.hbm_to_vmem [thread:$0]  (!%p4689_p7), %s4119_s15, 256, %s4122_s6, %s3943_s13, %s4686_s4, %s4686_s4, %s4685_s29  }
  0xba   : > { %s3554_s10 = scalar_lea.hbm %s4040_s30, 512  ;;  %p4691_p9 = scmp.ne.s32.totalorder %s4682_s12, 0 }
  0xbb   : > { %p3555_p0 = scmp.ne.s32.totalorder %s4040_s30, %s3554_s10  ;;  %s3559_s8 = scalar_lea.hbm %s4683_s11, 1024 }
  0xbc   : > { %p4692_p8 = pneg %p4691_p9  ;;  %p3560_p11 = scmp.lt.u32.totalorder %s4040_s30, %s4683_s11 }
  0xbd   : > { %p3561_p6 = scmp.lt.u32.totalorder %s3559_s8, %s3554_s10  ;;  %p3563_p1 = scmp.lt.u32.totalorder %s3554_s10, %s4040_s30 }
  0xbe   : > { %p3557_p2 = pnand %p3555_p0, %p4692_p8 }
  0xbf   : > { %p3562_p4 = por %p3561_p6, %p3560_p11 }
  0xc0   : > { %p3558_p5 = pneg %p3557_p2 }
  0xc1   : > { %p3564_p10 = por %p3563_p1, %p3562_p4 }
  0xc3   : > { %p3565_p3 = pnand %p3564_p10, %p3558_p5 }
  0xc5   : > { %3568 = shalt.err (!%p3565_p3)
}
  0xc6   : > { %s3569_s13 = scalar_lea.vmem %s4042_s16, 512  ;;  %p4693_p12 = pmov %p4692_p8 }
  0xc7   : > { %p3570_p7 = scmp.ne.s32.totalorder %s4042_s16, %s3569_s13  ;;  %s3722_s15 = smov [#allocation11]  }
  0xc8   : > { %s3574_s6 = sshll.u32 %s3722_s15, 4  ;;  %s3575_s6 = int_to_ptr.vmem [resolvable:$false] %s3574_s6 }
  0xc9   : > { %p3572_p13 = pnand %p3570_p7, %p4693_p12  ;;  %s3576_s25 = scalar_lea.vmem %s3575_s6, 1024 }
  0xca   : > { %p3577_p8 = scmp.lt.s32.totalorder %s4042_s16, %s3575_s6  ;;  %p3578_p2 = scmp.lt.s32.totalorder %s3576_s25, %s3569_s13 }
  0xcb   : > { %p3573_p0 = pneg %p3572_p13 }
  0xcc   : > { %p3579_p11 = por %p3578_p2, %p3577_p8 }
  0xce   : > { %p3580_p6 = pnand %p3579_p11, %p3573_p0 }
  0xd0   : > { %3583 = shalt.err (!%p3580_p6)
}
  0xd1   : > { %3260 = dma.hbm_to_vmem [thread:$0]  (!%p4691_p9), %s4040_s30, 512, %s4042_s16, %s4046_s17, %s4686_s4, %s4686_s4, %s4685_s29  }
  0xd2   : > { %p4694_p5 = scmp.ne.s32.totalorder %s4668_s28, 0 }
  0xd4   : > { %790 = sbr.rel (%p4694_p5) target bundleno = 3877 (0xf25), region = 96 }
  0xdb   : > { %s4179_s23 = sand.u32 1, %s3690_s1   ;;  %p4696_p4 = scmp.ne.s32.totalorder %s4659_s19, 0 }
  0xdc   : > { %4695 = sst [smem:[#allocation34_spill]] %s4179_s23  ;;  %s4182_s18 = sshll.u32 %s4179_s23, 4 }
  0xdd   : > { %s793_s12 = scalar_lea.sflag [#allocation4], %s4179_s23 }
  0xde   : > { %3657 = dma.done.wait (%p4696_p4), %s793_s12, 256  }
  0xdf   : > { %3659 = vsyncadd (%p4696_p4), %s793_s12, 4294967040  ;;  %s801_s28 = sand.u32 1, %s3887_s26  }
  0xe0   : > { %s802_s17 = scalar_lea.sflag [#allocation7], %s801_s28 }
  0xe1   : > { %3661 = dma.done.wait (%p4696_p4), %s802_s17, 512  }
  0xe2   : > { %3663 = vsyncadd (%p4696_p4), %s802_s17, 4294966784  ;;  %s4697_s16 = sld [smem:[#allocation17_spill]]  ;;  %s814_s9 = scalar_lea.vmem [#allocation8], %s4182_s18 }
  0xe3   : > { %s4698_s29 = sld [smem:[#allocation30_spill]]  ;;  %s820_s10 = scalar_lea.sflag [#allocation10], %s801_s28 }
  0xe8   : > { %s821_s4 = sand.u32 1, %s4697_s16  }
  0xe9   : > { %s2861_s0 = sshll.u32 %s821_s4, 5  ;;  %p4699_p9 = scmp.ne.s32.totalorder %s4698_s29, 0 }
  0xea   : > { %s4198_s5 = scalar_lea.vmem [#allocation9], %s2861_s0 }
  0xeb   : > { %3665 = dma.done.wait (%p4699_p9), %s820_s10, 1024  }
  0xec   : > { %3667 = vsyncadd (%p4699_p9), %s820_s10, 4294966272  ;;  %s4700_s26 = sld [smem:[#allocation22_spill]]  ;;  %s4702_s25 = sld [smem:[#allocation38_spill]] }
  0xed   : > { %s4703_s16 = sld [smem:[#allocation40_spill]]  ;;  %s4705_s14 = sld [smem:[#allocation42_spill]] }
  0xee   : > { %s4709_s10 = sld [smem:[#allocation48_spill]]  ;;  %s4711_s2 = sld [smem:[#allocation50_spill]] }
  0xef   : > { %s4271_s11 = scalar_lea.vmem [#allocation12], %s4182_s18 }
  0xf2   : > { %p957_p1 = scmp.lt.s32.totalorder %s4700_s26, 1  ;;  %p2872_p10 = scmp.ne.s32.totalorder %s4700_s26, 0 }
  0xf3   : > { %v1011_v0 = vld [vmem:[%s814_s9] sm:$0xff] (!%p2872_p10)  ;;  %vm1013_vm0 = vcmask (!%p2872_p10), 261120   ;;  %v1012_v1 = vld [vmem:[%s814_s9 + $0x8] sm:$0xff] (!%p2872_p10) }
  0xf4   : > { %s4206_s27 = scalar_select %p957_p1, %s4700_s26, 1 }
  0xf5   : > { %1014 = vst.msk [vmem:[#allocation2] sm:$0xff] (!%p2872_p10), %vm1013_vm0, %v1011_v0  ;;  %1015 = vst.msk [vmem:[#allocation2 + $0x8] sm:$0xff] (!%p2872_p10), %vm1013_vm0, %v1012_v1 }
  0xf6   : > { %s2930_s19 = sshll.u32 %s4206_s27, 5  ;;  %s2933_s3 = sshll.u32 %s4206_s27, 6 }
  0xf7   : > { %s961_s12 = scalar_lea.vmem %s4702_s25, %s2930_s19  ;;  %s4219_s29 = scalar_lea.vmem %s4703_s16, %s2930_s19 }
  0xf8   : > { %s4228_s22 = scalar_lea.vmem %s4705_s14, %s2930_s19  ;;  %s4246_s21 = scalar_lea.vmem %s4709_s10, %s2933_s3 }
  0xf9   : > { %s4710_s14 = sld [smem:[#allocation49_spill]]  ;;  %s997_s15 = scalar_lea.vmem %s4711_s2, %s4206_s27 }
  0xfa   : > { %s4712_s25 = sld [smem:[#allocation51_spill]]  ;;  %s4713_s16 = sld [smem:[#allocation52_spill]] }
  0xfb   : > { %s4714_s3 = sld [smem:[#allocation53_spill]]  ;;  %s4268_s10 = scalar_lea.vmem [#allocation11], %s2861_s0 }
  0xfc   : > { %1010 = sbr.rel (%p2872_p10) target bundleno = 259 (0x103), region = 120 }
  0xff   : > { %s994_s19 = scalar_lea.vmem %s4710_s14, %s4206_s27 }
 0x100   : > { %s1000_s1 = scalar_lea.vmem %s4712_s25, %s4206_s27  ;;  %s1003_s20 = scalar_lea.vmem %s4713_s16, %s4206_s27 }
 0x101   : > { %s1006_s30 = scalar_lea.vmem %s4714_s3, %s4206_s27 }
 0x103 PF: > { %v1022_v2 = vld [vmem:[%s961_s12] sm:$0xff]  ;;  %v1023_v3 = vld [vmem:[%s961_s12 + $0x8] sm:$0xff]  ;;  %v1024_v4 = vld [vmem:[%s961_s12 + $0x10] sm:$0xff]  ;;  %vm1033_vm1 = vcmask 261120   ;;  %s4715_s23 = scalar_lea.vmem [#allocation3], %s4182_s18  ;;  %s4717_s9 = scalar_lea.vmem [#allocation6], %s4182_s18 }
 0x104   : > { %v3137_v5 = vpack.c.bf16 %v1023_v3, %v1022_v2  ;;  %v1025_v6 = vld [vmem:[%s961_s12 + $0x18] sm:$0xff]  ;;  %v1018_v7 = vld [vmem:[%s4715_s23] sm:$0xff]  ;;  %v1116_v10 = vld [vmem:[%s4219_s29 + $0x8] sm:$0xff]  ;;  %s4716_s0 = smov %s4715_s23  ;;  %s4718_s26 = smov %s4717_s9  ;;  %vm1299_vm2 = vcmask 64512   ;;  %vm1389_vm4 = vcmask 130048   ;;  %vm2129_vm5 = vcmask 195584  }
 0x105   : > { %v3141_v8 = vpack.c.bf16 %v1025_v6, %v1024_v4  ;;  %3015 = vmatprep.mubr.msk.f32.mxu1 %vm1033_vm1, %v1018_v7  ;;  %v1115_v9 = vld [vmem:[%s4219_s29] sm:$0xff]  ;;  %v1117_v12 = vld [vmem:[%s4219_s29 + $0x10] sm:$0xff]  ;;  %v1118_v13 = vld [vmem:[%s4219_s29 + $0x18] sm:$0xff]  ;;  %s4719_s7 = sld [smem:[#allocation39_spill]]  ;;  %s3723_s8 = smov 120   ;;  %vm2380_vm6 = vcmask 523264  }
 0x106   : > { %3138 = vmatprep.subr.bf16.mxu1 %v3137_v5  ;;  %v3145_v11 = vpack.c.bf16 %v1116_v10, %v1115_v9  ;;  %v1019_v14 = vld [vmem:[%s4716_s0 + $0x8] sm:$0xff]  ;;  %v3149_v15 = vpack.c.bf16 %v1118_v13, %v1117_v12  ;;  %v1020_v16 = vld [vmem:[%s4717_s9] sm:$0xff]  ;;  %s4721_s2 = sld [smem:[#allocation41_spill]]  ;;  %vm4310_vm3 = vmpackc.low %vm1299_vm2, %vm1299_vm2  ;;  %s4725_s25 = sld [smem:[#allocation43_spill]] }
 0x107   : > { %3140 = vmatpush3.bf16.msra.mxu1 %v3137_v5  ;;  %v1021_v17 = vld [vmem:[%s4718_s26 + $0x8] sm:$0xff]  ;;  %v1207_v31 = vld [vmem:[%s4228_s22] sm:$0xff]  ;;  %v1209_v33 = vld [vmem:[%s4228_s22 + $0x10] sm:$0xff]  ;;  %s3724_s17 = smov 112   ;;  %s3725_s16 = smov 104  }
 0x108   : > { %3142 = vmatprep.subr.bf16.mxu1 %v3141_v8  ;;  %v1208_v32 = vld [vmem:[%s4228_s22 + $0x8] sm:$0xff]  ;;  %v1210_v35 = vld [vmem:[%s4228_s22 + $0x18] sm:$0xff]  ;;  %v4330_v36 = vld [vmem:[#allocation2] sm:$0xff]  ;;  %s3726_s4 = smov 8   ;;  %s3727_s3 = smov 16  }
 0x109   : > { %v3153_v34 = vpack.c.bf16 %v1208_v32, %v1207_v31  ;;  %v3157_v37 = vpack.c.bf16 %v1210_v35, %v1209_v33  ;;  %3037 = vmatprep.mubr.msk.f32.mxu0 %vm1033_vm1, %v4330_v36  ;;  %v4334_v38 = vld [vmem:[#allocation2 + $0x8] sm:$0xff]  ;;  %s3728_s23 = smov 24   ;;  %s4727_s9 = sld [smem:[#allocation45_spill]] }
 0x10a   : > { %s4731_s24 = sld [smem:[#allocation47_spill]] }
 0x10b   : > { %3144 = vmatpush3.bf16.msra.mxu1 %v3141_v8  ;;  %s4720_s14 = scalar_lea.vmem %s4719_s7, %s4206_s27  ;;  %3154 = vmatprep.subr.bf16.mxu0 %v3153_v34 }
 0x10c   : > { %3146 = vmatprep.subr.bf16.mxu1 %v3145_v11  ;;  %v2873_v18 = vld [vmem:[%s4720_s14] ss:$0 sm:$0xff]  ;;  %s4722_s6 = scalar_lea.vmem %s4721_s2, %s4206_s27  ;;  %3156 = vmatpush3.bf16.msra.mxu0 %v3153_v34  ;;  %s4726_s28 = scalar_lea.vmem %s4725_s25, %s4206_s27 }
 0x10d   : > { %v2876_v23 = vld [vmem:[%s4722_s6] ss:$0 sm:$0xff]  ;;  %3158 = vmatprep.subr.bf16.mxu0 %v3157_v37 }
 0x10e   : > { %3016 = vmatmul.mubr.msk.f32.vlgmr.msra.gmra.mrb[0].mxu1 %vm1033_vm1, %v1019_v14  ;;  %v2879_v4 = vld [vmem:[%s4726_s28] ss:$0 sm:$0xff] }
 0x10f   : > { %3148 = vmatpush3.bf16.msra.mxu1 %v3145_v11  ;;  %3026 = vmatprep.mubr.msk.f32.mxu1 %vm1033_vm1, %v1020_v16  ;;  %s4728_s26 = scalar_lea.vmem %s4727_s9, %s4206_s27 }
 0x110   : > { %3150 = vmatprep.subr.bf16.mxu1 %v3149_v15  ;;  %3160 = vmatpush3.bf16.msra.mxu0 %v3157_v37 }
 0x113   : > { %3152 = vmatpush3.bf16.msra.mxu1 %v3149_v15  ;;  %3038 = vmatmul.mubr.msk.f32.vlgmr.msra.gmra.mrb[0].mxu0 %vm1033_vm1, %v4334_v38 }
 0x116   : > { %3027 = vmatmul.mubr.msk.f32.vlgmr.msra.gmra.mrb[2].mxu1 %vm1033_vm1, %v1021_v17 }
 0x1e1   : > { %v3017_v19 = vpop.f32.mrb[0].mxu1 }
 0x1e2   : > { %v4295_v20 = vadd.f32 %v3017_v19, %v2873_v18  ;;  %v1106_v21 = vpop.f32.mrb[1].mxu1 }
 0x1e3   : > { %v4297_v22 = vadd.f32 %v2873_v18, %v1106_v21 }
 0x1e4   : > { %1495 = vrot.lane.b32.xlu1 %v4295_v20, %s3723_s8 }
 0x1e5   : > { %3044 = vmatprep.mubr.msk.f32.mxu1 %vm1299_vm2, %v4297_v22 }
 0x1e6   : > { %v3039_v3 = vpop.f32.mrb[0].mxu0 }
 0x1e7   : > { %v1296_v5 = vadd.f32 %v3039_v3, %v2879_v4  ;;  %v1290_v6 = vpop.f32.mrb[1].mxu0 }
 0x1e8   : > { %v1291_v7 = vadd.f32 %v2879_v4, %v1290_v6 }
 0x1e9   : > { %v3028_v24 = vpop.f32.mrb[2].mxu1 }
 0x1ea   : > { %v1204_v25 = vadd.f32 %v3028_v24, %v2876_v23  ;;  %v1198_v26 = vpop.f32.mrb[3].mxu1  ;;  %v4355_v8 = vpack.i.bf16 %v1296_v5, %v1291_v7  ;;  %v3167_v9 = vpack.c.bf16 %v1296_v5, %v1291_v7 }
 0x1eb   : > { %v1199_v27 = vadd.f32 %v2876_v23, %v1198_v26 }
 0x1ec   : > { %3168 = vmatprep.subr.bf16.mxu0 %v3167_v9 }
 0x1ed   : > { %v4314_v29 = vpack.i.bf16 %v1204_v25, %v1199_v27  ;;  %v3161_v30 = vpack.c.bf16 %v1204_v25, %v1199_v27  ;;  %3170 = vmatpush3.bf16.msra.mxu0 %v3167_v9 }
 0x1ef   : > { %3365 = vrot.lane.b32.xlu0 %v4314_v29, %s3723_s8  ;;  %3163 = vmatprep.subr.msk.bf16.mxu1 %vm4310_vm3, %v3161_v30 }
 0x1f0   : > { %3166 = vmatpush3.bf16.xpose.msk.msra.mxu1 %vm4310_vm3, %v3161_v30 }
 0x1f3   : > { %1493 = vrot.lane.b32.xlu0 %v4297_v22, %s3723_s8 }
 0x1f7   : > { %3045 = vmatmul.mubr.msk.f32.vlgmr.msra.gmra.mrb[4].mxu1 %vm1299_vm2, %v4295_v20 }
 0x256   : > { %v1496_v44 = vpop.permute.xlu1 %1495 }
 0x261   : > { %v3366_v39 = vpop.permute.xlu0 %3365 }
 0x262   : > { %v3368_v40 = vunpack.i.h.bf16 %v3366_v39  ;;  %v3367_v41 = vunpack.i.l.bf16 %v3366_v39 }
 0x264   : > { %v3171_v42 = vpack.c.bf16 %v3368_v40, %v3367_v41 }
 0x265   : > { %v1494_v43 = vpop.permute.xlu0 %1493 }
 0x266   : > { %3173 = vmatprep.subr.msk.bf16.mxu1 %vm4310_vm3, %v3171_v42  ;;  %3058 = vmatprep.mubr.msk.f32.mxu1 %vm1299_vm2, %v1494_v43 }
 0x267   : > { %3176 = vmatpush3.bf16.xpose.msk.msra.mxu1 %vm4310_vm3, %v3171_v42 }
 0x26e   : > { %3059 = vmatmul.mubr.msk.f32.vlgmr.msra.gmra.mrb[6].mxu1 %vm1299_vm2, %v1496_v44 }
 0x2ca   : > { %v3046_v45 = vpop.f32.mrb[4].mxu1 }
 0x2cb   : > { %v1388_v46 = vmul.f32 0.35355338, %v3046_v45  ;;  %v1378_v47 = vpop.f32.mrb[5].mxu1 }
 0x2cc   : > { %v1387_v48 = vmul.f32 0.35355338, %v1378_v47 }
 0x2cd   : > { %v1393_v49 = vsel %vm1389_vm4, %v1388_v46, -inf }
 0x2ce   : > { %1394 = vmax.xlane.f32.xlu0 %v1393_v49  ;;  %v1390_v50 = vsel %vm1389_vm4, %v1387_v48, -inf }
 0x2cf   : > { %1391 = vmax.xlane.f32.xlu1 %v1390_v50 }
 0x341   : > { %v3060_v51 = vpop.f32.mrb[6].mxu1 }
 0x342   : > { %v1585_v52 = vmul.f32 0.35355338, %v3060_v51  ;;  %v1575_v53 = vpop.f32.mrb[7].mxu1 }
 0x343   : > { %v1584_v54 = vmul.f32 0.35355338, %v1575_v53 }
 0x344   : > { %v1589_v55 = vsel %vm1389_vm4, %v1585_v52, -inf }
 0x345   : > { %1590 = vmax.xlane.f32.xlu1 %v1589_v55  ;;  %v1586_v56 = vsel %vm1389_vm4, %v1584_v54, -inf }
 0x346   : > { %1587 = vmax.xlane.f32.xlu0 %v1586_v56 }
 0x35b   : > { %v1395_v57 = vpop.xlane.xlu0 %1394 }
 0x35c   : > { %v1397_v58 = vsub.f32 %v1388_v46, %v1395_v57  ;;  %v1392_v59 = vpop.xlane.xlu1 %1391 }
 0x35d   : > { %v1396_v60 = vsub.f32 %v1387_v48, %v1392_v59 }
 0x35e   : > { %v1400_v61 = vmul.f32 1.442695, %v1397_v58 }
 0x35f   : > { %v1398_v62 = vmul.f32 1.442695, %v1396_v60 }
 0x360   : > { %3394 = vpow2.f32 %v1400_v61 }
 0x361   : > { %3396 = vpow2.f32 %v1398_v62 }
 0x36a   : > { %v3395_v63 = vpop.eup %3394 }
 0x36b   : > { %v3397_v0 = vpop.eup %3396  ;;  %v1405_v1 = vsel %vm1389_vm4, %v3395_v63, 0.0 }
 0x36c   : > { %1406 = vadd.xlane.f32.xlu1 %v1405_v1  ;;  %v1402_v2 = vsel %vm1389_vm4, %v3397_v0, 0.0 }
 0x36d   : > { %1403 = vadd.xlane.f32.xlu0 %v1402_v2 }
 0x3d2   : > { %v1591_v10 = vpop.xlane.xlu1 %1590 }
 0x3d3   : > { %v1593_v11 = vsub.f32 %v1585_v52, %v1591_v10  ;;  %v1588_v12 = vpop.xlane.xlu0 %1587 }
 0x3d4   : > { %v1592_v13 = vsub.f32 %v1584_v54, %v1588_v12 }
 0x3d5   : > { %v1596_v14 = vmul.f32 1.442695, %v1593_v11 }
 0x3d6   : > { %v1594_v15 = vmul.f32 1.442695, %v1592_v13 }
 0x3d7   : > { %3398 = vpow2.f32 %v1596_v14 }
 0x3d8   : > { %3400 = vpow2.f32 %v1594_v15 }
 0x3e1   : > { %v3399_v16 = vpop.eup %3398 }
 0x3e2   : > { %v3401_v17 = vpop.eup %3400  ;;  %v1601_v18 = vsel %vm1389_vm4, %v3399_v16, 0.0 }
 0x3e3   : > { %1602 = vadd.xlane.f32.xlu1 %v1601_v18  ;;  %v1598_v19 = vsel %vm1389_vm4, %v3401_v17, 0.0 }
 0x3e4   : > { %1599 = vadd.xlane.f32.xlu0 %v1598_v19 }
 0x3f4   : > { %3375 = vrot.lane.b32.xlu1 %v4314_v29, %s3724_s17 }
 0x3f8   : > { %1697 = vrot.lane.b32.xlu1 %v4297_v22, %s3724_s17 }
 0x3f9   : > { %v1407_v21 = vpop.xlane.xlu1 %1406 }
 0x3fa   : > { %3402 = vrcp.f32 %v1407_v21  ;;  %v1404_v23 = vpop.xlane.xlu0 %1403  ;;  %3370 = vrot.lane.b32.xlu0 %v4355_v8, %s3723_s8 }
 0x3fb   : > { %3404 = vrcp.f32 %v1404_v23 }
 0x3fe   : > { %1699 = vrot.lane.b32.xlu0 %v4295_v20, %s3724_s17 }
 0x404   : > { %v3403_v24 = vpop.eup %3402 }
 0x405   : > { %v3405_v25 = vpop.eup %3404  ;;  %v1411_v27 = vmul.f32 %v3403_v24, %v3395_v63 }
 0x406   : > { %v1409_v26 = vmul.f32 %v3405_v25, %v3397_v0 }
 0x408   : > { %3051 = vmatprep.mubr.msk.f32.mxu0 %vm1389_vm4, %v1409_v26 }
 0x409   : > { %3052 = vmatmul.mubr.msk.f32.vlgmr.msra.gmra.mrb[2].mxu0 %vm1389_vm4, %v1411_v27 }
 0x470   : > { %v1603_v30 = vpop.xlane.xlu1 %1602 }
 0x471   : > { %3406 = vrcp.f32 %v1603_v30  ;;  %v1600_v31 = vpop.xlane.xlu0 %1599 }
 0x472   : > { %3408 = vrcp.f32 %v1600_v31 }
 0x474   : > { %v3376_v32 = vpop.permute.xlu1 %3375 }
 0x475   : > { %v3371_v33 = vpop.permute.xlu0 %3370  ;;  %v3378_v34 = vunpack.i.h.bf16 %v3376_v32  ;;  %v3377_v35 = vunpack.i.l.bf16 %v3376_v32 }
 0x476   : > { %v3373_v37 = vunpack.i.h.bf16 %v3371_v33  ;;  %v3372_v39 = vunpack.i.l.bf16 %v3371_v33 }
 0x477   : > { %v3181_v41 = vpack.c.bf16 %v3378_v34, %v3377_v35 }
 0x478   : > { %v3177_v40 = vpack.c.bf16 %v3373_v37, %v3372_v39  ;;  %v1698_v46 = vpop.permute.xlu1 %1697 }
 0x479   : > { %v1700_v47 = vpop.permute.xlu0 %1699 }
 0x47a   : > { %3178 = vmatprep.subr.bf16.mxu0 %v3177_v40 }
 0x47b   : > { %v3407_v42 = vpop.eup %3406  ;;  %3180 = vmatpush3.bf16.msra.mxu0 %v3177_v40 }
 0x47c   : > { %v3409_v43 = vpop.eup %3408  ;;  %3183 = vmatprep.subr.msk.bf16.mxu0 %vm4310_vm3, %v3181_v41  ;;  %v1607_v45 = vmul.f32 %v3407_v42, %v3399_v16 }
 0x47d   : > { %v1605_v44 = vmul.f32 %v3409_v43, %v3401_v17 }
 0x47f   : > { %3065 = vmatprep.mubr.msk.f32.mxu0 %vm1389_vm4, %v1605_v44 }
 0x480   : > { %3066 = vmatmul.mubr.msk.f32.vlgmr.msra.gmra.mrb[4].mxu0 %vm1389_vm4, %v1607_v45 }
 0x481   : > { %3072 = vmatprep.mubr.msk.f32.mxu0 %vm1299_vm2, %v1698_v46 }
 0x484   : > { %3186 = vmatpush3.bf16.xpose.msk.msra.mxu0 %vm4310_vm3, %v3181_v41 }
 0x48b   : > { %3073 = vmatmul.mubr.msk.f32.vlgmr.msra.gmra.mrb[6].mxu0 %vm1299_vm2, %v1700_v47 }
 0x4dc   : > { %v4377_v48 = vpop.f32.mrb[2].mxu0 }
 0x4dd   : > { %v4379_v49 = vpop.f32.mrb[3].mxu0 }
 0x553   : > { %v4381_v50 = vpop.f32.mrb[4].mxu0 }
 0x554   : > { %v4383_v51 = vpop.f32.mrb[5].mxu0 }
 0x55e   : > { %v3074_v52 = vpop.f32.mrb[6].mxu0 }
 0x55f   : > { %v1789_v53 = vmul.f32 0.35355338, %v3074_v52  ;;  %v1779_v54 = vpop.f32.mrb[7].mxu0  ;;  %v2132_v52 = vld [vmem:[%s4198_s5] sm:$0xff] }
 0x560   : > { %v1788_v55 = vmul.f32 0.35355338, %v1779_v54  ;;  %v2134_v54 = vld [vmem:[%s4198_s5 + $0x10] sm:$0xff] }
 0x561   : > { %v1793_v56 = vsel %vm1389_vm4, %v1789_v53, -inf }
 0x562   : > { %1794 = vmax.xlane.f32.xlu0 %v1793_v56  ;;  %v1790_v57 = vsel %vm1389_vm4, %v1788_v55, -inf  ;;  %v2135_v56 = vld [vmem:[%s4198_s5 + $0x18] sm:$0xff] }
 0x563   : > { %1791 = vmax.xlane.f32.xlu1 %v1790_v57  ;;  %v3205_v57 = vpack.c.bf16 %v2135_v56, %v2134_v54 }
 0x5ef   : > { %v1795_v58 = vpop.xlane.xlu0 %1794 }
 0x5f0   : > { %v1797_v59 = vsub.f32 %v1789_v53, %v1795_v58  ;;  %v1792_v60 = vpop.xlane.xlu1 %1791  ;;  %v2133_v53 = vld [vmem:[%s4198_s5 + $0x8] sm:$0xff] }
 0x5f1   : > { %v1796_v61 = vsub.f32 %v1788_v55, %v1792_v60  ;;  %v3201_v55 = vpack.c.bf16 %v2133_v53, %v2132_v52 }
 0x5f2   : > { %v1800_v62 = vmul.f32 1.442695, %v1797_v59 }
 0x5f3   : > { %v1798_v63 = vmul.f32 1.442695, %v1796_v61 }
 0x5f4   : > { %3410 = vpow2.f32 %v1800_v62 }
 0x5f5   : > { %3412 = vpow2.f32 %v1798_v63 }
 0x5fe   : > { %v3411_v0 = vpop.eup %3410 }
 0x5ff   : > { %v3413_v1 = vpop.eup %3412  ;;  %v1805_v2 = vsel %vm1389_vm4, %v3411_v0, 0.0 }
 0x600   : > { %1806 = vadd.xlane.f32.xlu1 %v1805_v2  ;;  %v1802_v3 = vsel %vm1389_vm4, %v3413_v1, 0.0 }
 0x601   : > { %1803 = vadd.xlane.f32.xlu0 %v1802_v3 }
 0x611   : > { %3385 = vrot.lane.b32.xlu1 %v4314_v29, %s3725_s16 }
 0x615   : > { %1899 = vrot.lane.b32.xlu1 %v4297_v22, %s3725_s16 }
 0x617   : > { %3380 = vrot.lane.b32.xlu0 %v4355_v8, %s3724_s17 }
 0x61b   : > { %1901 = vrot.lane.b32.xlu0 %v4295_v20, %s3725_s16 }
 0x68d   : > { %v1807_v4 = vpop.xlane.xlu1 %1806 }
 0x68e   : > { %3414 = vrcp.f32 %v1807_v4  ;;  %v1804_v5 = vpop.xlane.xlu0 %1803 }
 0x68f   : > { %3416 = vrcp.f32 %v1804_v5 }
 0x691   : > { %v3386_v6 = vpop.permute.xlu1 %3385 }
 0x692   : > { %v3381_v7 = vpop.permute.xlu0 %3380  ;;  %v3388_v9 = vunpack.i.h.bf16 %v3386_v6  ;;  %v3387_v10 = vunpack.i.l.bf16 %v3386_v6 }
 0x693   : > { %v3383_v11 = vunpack.i.h.bf16 %v3381_v7  ;;  %v3382_v12 = vunpack.i.l.bf16 %v3381_v7 }
 0x694   : > { %v3191_v13 = vpack.c.bf16 %v3388_v9, %v3387_v10 }
 0x695   : > { %v3187_v29 = vpack.c.bf16 %v3383_v11, %v3382_v12  ;;  %v1900_v16 = vpop.permute.xlu1 %1899 }
 0x696   : > { %v1902_v17 = vpop.permute.xlu0 %1901 }
 0x697   : > { %3188 = vmatprep.subr.bf16.mxu1 %v3187_v29 }
 0x698   : > { %v3415_v22 = vpop.eup %3414  ;;  %3190 = vmatpush3.bf16.msra.mxu1 %v3187_v29 }
 0x699   : > { %v3417_v14 = vpop.eup %3416  ;;  %3193 = vmatprep.subr.msk.bf16.mxu1 %vm4310_vm3, %v3191_v13  ;;  %v1811_v15 = vmul.f32 %v3415_v22, %v3411_v0 }
 0x69a   : > { %v1809_v20 = vmul.f32 %v3417_v14, %v3413_v1 }
 0x69c   : > { %3079 = vmatprep.mubr.msk.f32.mxu1 %vm1389_vm4, %v1809_v20 }
 0x69d   : > { %3080 = vmatmul.mubr.msk.f32.vlgmr.msra.gmra.mrb[8].mxu1 %vm1389_vm4, %v1811_v15 }
 0x69e   : > { %3086 = vmatprep.mubr.msk.f32.mxu1 %vm1299_vm2, %v1900_v16 }
 0x6a1   : > { %3196 = vmatpush3.bf16.xpose.msk.msra.mxu1 %vm4310_vm3, %v3191_v13 }
 0x6a8   : > { %3087 = vmatmul.mubr.msk.f32.vlgmr.msra.gmra.mrb[10].mxu1 %vm1299_vm2, %v1902_v17 }
 0x770   : > { %v3081_v18 = vpop.f32.mrb[8].mxu1 }
 0x771   : > { %v1890_v19 = vpop.f32.mrb[9].mxu1 }
 0x77b   : > { %v3088_v21 = vpop.f32.mrb[10].mxu1 }
 0x77c   : > { %v1991_v23 = vmul.f32 0.35355338, %v3088_v21  ;;  %v1981_v24 = vpop.f32.mrb[11].mxu1 }
 0x77d   : > { %v1990_v25 = vmul.f32 0.35355338, %v1981_v24  ;;  %v2272_v24 = vld [vmem:[%s4268_s10 + $0x8] sm:$0xff] }
 0x77e   : > { %v1995_v26 = vsel %vm1389_vm4, %v1991_v23, -inf }
 0x77f   : > { %1996 = vmax.xlane.f32.xlu0 %v1995_v26  ;;  %v1992_v27 = vsel %vm1389_vm4, %v1990_v25, -inf  ;;  %v2273_v26 = vld [vmem:[%s4268_s10 + $0x10] sm:$0xff] }
 0x780   : > { %1993 = vmax.xlane.f32.xlu1 %v1992_v27  ;;  %v2274_v27 = vld [vmem:[%s4268_s10 + $0x18] sm:$0xff] }
 0x80c   : > { %v1997_v30 = vpop.xlane.xlu0 %1996 }
 0x80d   : > { %v1999_v31 = vsub.f32 %v1991_v23, %v1997_v30  ;;  %v1994_v32 = vpop.xlane.xlu1 %1993  ;;  %v2271_v23 = vld [vmem:[%s4268_s10] sm:$0xff]  ;;  %v3213_v30 = vpack.c.bf16 %v2274_v27, %v2273_v26  ;;  %v2917_v26 = vld [vmem:[%s1003_s20] ss:$0 sm:$0xff] }
 0x80e   : > { %v1998_v28 = vsub.f32 %v1990_v25, %v1994_v32  ;;  %v3209_v25 = vpack.c.bf16 %v2272_v24, %v2271_v23  ;;  %v2366_v32 = vld [vmem:[%s4246_s21 + $0x8] sm:$0xff] }
 0x80f   : > { %v2002_v33 = vmul.f32 1.442695, %v1999_v31  ;;  %v2365_v31 = vld [vmem:[%s4246_s21] sm:$0xff] }
 0x810   : > { %v2000_v34 = vmul.f32 1.442695, %v1998_v28  ;;  %3210 = vmatprep.subr.bf16.mxu1 %v3209_v25  ;;  %v2367_v28 = vld [vmem:[%s4246_s21 + $0x10] sm:$0xff] }
 0x811   : > { %3418 = vpow2.f32 %v2002_v33  ;;  %3212 = vmatpush3.bf16.msra.mxu1 %v3209_v25  ;;  %v3217_v33 = vpack.c.bf16 %v2366_v32, %v2365_v31  ;;  %v2918_v31 = vld [vmem:[%s1006_s30] ss:$0 sm:$0xff] }
 0x812   : > { %3420 = vpow2.f32 %v2000_v34  ;;  %3214 = vmatprep.subr.bf16.mxu1 %v3213_v30  ;;  %v2368_v34 = vld [vmem:[%s4246_s21 + $0x18] sm:$0xff] }
 0x815   : > { %3216 = vmatpush3.bf16.msra.mxu1 %v3213_v30 }
 0x81b   : > { %v3419_v35 = vpop.eup %3418 }
 0x81c   : > { %v3421_v37 = vpop.eup %3420  ;;  %v2007_v39 = vsel %vm1389_vm4, %v3419_v35, 0.0 }
 0x81d   : > { %2008 = vadd.xlane.f32.xlu1 %v2007_v39  ;;  %v2004_v40 = vsel %vm1389_vm4, %v3421_v37, 0.0  ;;  %v2370_v39 = vld [vmem:[%s4246_s21 + $0x28] sm:$0xff] }
 0x81e   : > { %2005 = vadd.xlane.f32.xlu0 %v2004_v40 }
 0x82e   : > { %2103 = vrot.lane.b32.xlu1 %v4383_v51, %s3726_s4 }
 0x832   : > { %2105 = vrot.lane.b32.xlu1 %v4381_v50, %s3726_s4 }
 0x834   : > { %3390 = vrot.lane.b32.xlu0 %v4355_v8, %s3725_s16  ;;  %s4736_s16 = sld [smem:[#allocation22_spill]] }
 0x836   : > { %2113 = vrot.lane.b32.xlu1 %v3081_v18, %s3727_s3 }
 0x838   : > { %2111 = vrot.lane.b32.xlu0 %v1890_v19, %s3727_s3 }
 0x83a   : > { %p2919_p3 = scmp.ne.s32.totalorder %s4736_s16, 1 }
 0x8aa   : > { %v2009_v41 = vpop.xlane.xlu1 %2008 }
 0x8ab   : > { %3422 = vrcp.f32 %v2009_v41  ;;  %v2006_v42 = vpop.xlane.xlu0 %2005 }
 0x8ac   : > { %3424 = vrcp.f32 %v2006_v42 }
 0x8ae   : > { %v2104_v60 = vpop.permute.xlu1 %2103 }
 0x8af   : > { %v3391_v43 = vpop.permute.xlu0 %3390  ;;  %v2125_v0 = vsel %vm1299_vm2, %v4379_v49, %v2104_v60  ;;  %v2906_v49 = vld [vmem:[%s4728_s26] ss:$0 sm:$0xff] }
 0x8b0   : > { %v3393_v44 = vunpack.i.h.bf16 %v3391_v43  ;;  %v3392_v45 = vunpack.i.l.bf16 %v3391_v43 }
 0x8b2   : > { %v3197_v46 = vpack.c.bf16 %v3393_v44, %v3392_v45  ;;  %v2106_v61 = vpop.permute.xlu1 %2105 }
 0x8b3   : > { %v2112_v63 = vpop.permute.xlu0 %2111  ;;  %v2126_v2 = vsel %vm1299_vm2, %v4377_v48, %v2106_v61 }
 0x8b4   : > { %3198 = vmatprep.subr.bf16.mxu0 %v3197_v46  ;;  %v2127_v3 = vsel %vm1389_vm4, %v2125_v0, %v2112_v63 }
 0x8b5   : > { %v3423_v47 = vpop.eup %3422  ;;  %3200 = vmatpush3.bf16.msra.mxu0 %v3197_v46 }
 0x8b6   : > { %v3425_v50 = vpop.eup %3424  ;;  %v2013_v51 = vmul.f32 %v3423_v47, %v3419_v35  ;;  %3202 = vmatprep.subr.bf16.mxu0 %v3201_v55  ;;  %v2114_v62 = vpop.permute.xlu1 %2113  ;;  %v3221_v35 = vpack.c.bf16 %v2368_v34, %v2367_v28 }
 0x8b7   : > { %v2011_v8 = vmul.f32 %v3425_v50, %v3421_v37  ;;  %v2128_v5 = vsel %vm1389_vm4, %v2126_v2, %v2114_v62  ;;  %v2369_v37 = vld [vmem:[%s4246_s21 + $0x20] sm:$0xff] }
 0x8b8   : > { %v3225_v40 = vpack.c.bf16 %v2370_v39, %v2369_v37  ;;  %v2909_v50 = vld [vmem:[%s997_s15] ss:$0 sm:$0xff] }
 0x8b9   : > { %3093 = vmatprep.mubr.msk.f32.mxu0 %vm1389_vm4, %v2011_v8 }
 0x8ba   : > { %3094 = vmatmul.mubr.msk.f32.vlgmr.msra.gmra.mrb[8].mxu0 %vm1389_vm4, %v2013_v51  ;;  %v2910_v51 = vld [vmem:[%s1000_s1] ss:$0 sm:$0xff]  ;;  %s4732_s1 = scalar_lea.vmem %s4731_s24, %s4206_s27 }
 0x8bb   : > { %3204 = vmatpush3.bf16.msra.mxu0 %v3201_v55  ;;  %v2911_v61 = vld [vmem:[%s4732_s1] ss:$0 sm:$0xff] }
 0x8bc   : > { %3206 = vmatprep.subr.bf16.mxu0 %v3205_v57 }
 0x8bf   : > { %3208 = vmatpush3.bf16.msra.mxu0 %v3205_v57 }
 0x8c0   : > { %3218 = vmatprep.subr.bf16.mxu0 %v3217_v33 }
 0x98d   : > { %v3095_v58 = vpop.f32.mrb[8].mxu0 }
 0x98e   : > { %2121 = vrot.lane.b32.xlu1 %v3095_v58, %s3728_s23  ;;  %v2092_v59 = vpop.f32.mrb[9].mxu0  ;;  %v2371_v58 = vld [vmem:[%s4246_s21 + $0x30] sm:$0xff] }
 0x98f   : > { %2119 = vrot.lane.b32.xlu0 %v2092_v59, %s3728_s23  ;;  %v2372_v59 = vld [vmem:[%s4246_s21 + $0x38] sm:$0xff] }
 0x990   : > { %v3229_v60 = vpack.c.bf16 %v2372_v59, %v2371_v58 }
 0xa00   : > { %v2122_v1 = vpop.permute.xlu1 %2121 }
 0xa01   : > { %v2120_v4 = vpop.permute.xlu0 %2119  ;;  %v2131_v7 = vsel %vm2129_vm5, %v2128_v5, %v2122_v1 }
 0xa02   : > { %v2130_v6 = vsel %vm2129_vm5, %v2127_v3, %v2120_v4  ;;  %v2914_v4 = vld [vmem:[%s994_s19] ss:$0 sm:$0xff] }
 0xa03   : > { %3104 = vmatprep.mubr.msk.f32.mxu0 %vm1033_vm1, %v2130_v6 }
 0xa04   : > { %3105 = vmatmul.mubr.msk.f32.vlgmr.msra.gmra.mrb[10].mxu0 %vm1033_vm1, %v2131_v7 }
 0xa05   : > { %3220 = vmatpush3.bf16.msra.mxu0 %v3217_v33 }
 0xa06   : > { %3222 = vmatprep.subr.bf16.mxu0 %v3221_v35 }
 0xa09   : > { %3224 = vmatpush3.bf16.msra.mxu0 %v3221_v35 }
 0xa0a   : > { %3226 = vmatprep.subr.bf16.mxu0 %v3225_v40 }
 0xa0d   : > { %3228 = vmatpush3.bf16.msra.mxu0 %v3225_v40 }
 0xa0e   : > { %3230 = vmatprep.subr.bf16.mxu0 %v3229_v60 }
 0xa11   : > { %3232 = vmatpush3.bf16.msra.mxu0 %v3229_v60 }
 0xad7   : > { %v3106_v9 = vpop.f32.mrb[10].mxu0 }
 0xad8   : > { %v2221_v10 = vadd.f32 %v3106_v9, %v2906_v49  ;;  %v2215_v11 = vpop.f32.mrb[11].mxu0 }
 0xad9   : > { %v2216_v48 = vadd.f32 %v2906_v49, %v2215_v11 }
 0xada   : > { %v2225_v12 = vadd.f32 %v2221_v10, %v4334_v38 }
 0xadb   : > { %v2224_v29 = vadd.f32 %v2216_v48, %v4330_v36 }
 0xadc   : > { %v2231_v13 = vsel %vm1033_vm1, %v2225_v12, 0.0 }
 0xadd   : > { %2232 = vadd.xlane.f32.xlu1 %v2231_v13  ;;  %v2228_v22 = vsel %vm1033_vm1, %v2224_v29, 0.0 }
 0xade   : > { %2229 = vadd.xlane.f32.xlu0 %v2228_v22 }
 0xb6a   : > { %v2233_v14 = vpop.xlane.xlu1 %2232 }
 0xb6b   : > { %v2236_v20 = vmul.f32 0.03125, %v2233_v14  ;;  %v2230_v15 = vpop.xlane.xlu0 %2229 }
 0xb6c   : > { %v2235_v16 = vmul.f32 0.03125, %v2230_v15 }
 0xb6d   : > { %v2238_v17 = vsub.f32 %v2225_v12, %v2236_v20 }
 0xb6e   : > { %v2237_v18 = vsub.f32 %v2224_v29, %v2235_v16 }
 0xb6f   : > { %v2240_v38 = vmul.f32 %v2238_v17, %v2238_v17 }
 0xb70   : > { %v2239_v19 = vmul.f32 %v2237_v18, %v2237_v18 }
 0xb71   : > { %v2244_v21 = vsel %vm1033_vm1, %v2240_v38, 0.0 }
 0xb72   : > { %v2241_v36 = vsel %vm1033_vm1, %v2239_v19, 0.0 }
 0xb73   : > { %2242 = vadd.xlane.f32.xlu0 %v2241_v36 }
 0xb77   : > { %2245 = vadd.xlane.f32.xlu0 %v2244_v21 }
 0xc00   : > { %v2243_v41 = vpop.xlane.xlu0 %2242 }
 0xc01   : > { %v2247_v42 = vmul.f32 0.03125, %v2243_v41 }
 0xc03   : > { %v2249_v43 = vadd.f32 1e-05, %v2247_v42 }
 0xc04   : > { %v2246_v44 = vpop.xlane.xlu0 %2245 }
 0xc05   : > { %3426 = vrsqrt.f32 %v2249_v43  ;;  %v2248_v45 = vmul.f32 0.03125, %v2246_v44 }
 0xc07   : > { %v2250_v46 = vadd.f32 1e-05, %v2248_v45 }
 0xc09   : > { %3428 = vrsqrt.f32 %v2250_v46 }
 0xc0f   : > { %v3427_v47 = vpop.eup %3426 }
 0xc10   : > { %v2253_v8 = vmul.f32 %v3427_v47, %v2237_v18 }
 0xc12   : > { %v2261_v52 = vmul.f32 %v2909_v50, %v2253_v8 }
 0xc13   : > { %v3429_v53 = vpop.eup %3428 }
 0xc14   : > { %v2254_v54 = vmul.f32 %v3429_v53, %v2238_v17  ;;  %v2269_v55 = vadd.f32 %v2910_v51, %v2261_v52 }
 0xc16   : > { %v2262_v56 = vmul.f32 %v2909_v50, %v2254_v54  ;;  %3115 = vmatprep.mubr.msk.f32.mxu1 %vm1033_vm1, %v2269_v55 }
 0xc18   : > { %v2270_v57 = vadd.f32 %v2910_v51, %v2262_v56 }
 0xc1a   : > { %3116 = vmatmul.mubr.msk.f32.vlgmr.msra.gmra.mrb[12].mxu1 %vm1033_vm1, %v2270_v57 }
 0xced   : > { %v3117_v62 = vpop.f32.mrb[12].mxu1 }
 0xcee   : > { %v2360_v63 = vadd.f32 %v3117_v62, %v2911_v61  ;;  %v2354_v0 = vpop.f32.mrb[13].mxu1 }
 0xcef   : > { %v2355_v1 = vadd.f32 %v2911_v61, %v2354_v0 }
 0xcf0   : > { %v2364_v3 = vmax.f32 %v2360_v63, 0.0 }
 0xcf1   : > { %v2363_v2 = vmax.f32 %v2355_v1, 0.0 }
 0xcf3   : > { %3134 = vmatprep.mubr.msk.f32.mxu0 %vm2380_vm6, %v2363_v2 }
 0xcf4   : > { %3135 = vmatmul.mubr.msk.f32.vlgmr.msra.gmra.mrb[12].mxu0 %vm2380_vm6, %v2364_v3 }
 0xdc7   : > { %v3136_v5 = vpop.f32.mrb[12].mxu0 }
 0xdc8   : > { %v2459_v6 = vadd.f32 %v3136_v5, %v2914_v4  ;;  %v2453_v7 = vpop.f32.mrb[13].mxu0 }
 0xdc9   : > { %v2454_v49 = vadd.f32 %v2914_v4, %v2453_v7 }
 0xdca   : > { %v2463_v9 = vadd.f32 %v2459_v6, %v2270_v57 }
 0xdcb   : > { %v2462_v10 = vadd.f32 %v2454_v49, %v2269_v55 }
 0xdcc   : > { %v2469_v11 = vsel %vm1033_vm1, %v2463_v9, 0.0 }
 0xdcd   : > { %2470 = vadd.xlane.f32.xlu0 %v2469_v11  ;;  %v2466_v48 = vsel %vm1033_vm1, %v2462_v10, 0.0 }
 0xdce   : > { %2467 = vadd.xlane.f32.xlu1 %v2466_v48 }
 0xe5a   : > { %v2471_v12 = vpop.xlane.xlu0 %2470 }
 0xe5b   : > { %v2473_v29 = vmul.f32 0.03125, %v2471_v12  ;;  %v2468_v13 = vpop.xlane.xlu1 %2467 }
 0xe5c   : > { %v2472_v22 = vmul.f32 0.03125, %v2468_v13 }
 0xe5d   : > { %v2475_v14 = vsub.f32 %v2463_v9, %v2473_v29 }
 0xe5e   : > { %v2474_v20 = vsub.f32 %v2462_v10, %v2472_v22 }
 0xe5f   : > { %v2477_v15 = vmul.f32 %v2475_v14, %v2475_v14 }
 0xe60   : > { %v2476_v16 = vmul.f32 %v2474_v20, %v2474_v20 }
 0xe61   : > { %v2481_v17 = vsel %vm1033_vm1, %v2477_v15, 0.0 }
 0xe62   : > { %2482 = vadd.xlane.f32.xlu0 %v2481_v17  ;;  %v2478_v18 = vsel %vm1033_vm1, %v2476_v16, 0.0 }
 0xe63   : > { %2479 = vadd.xlane.f32.xlu1 %v2478_v18 }
 0xeef   : > { %v2483_v19 = vpop.xlane.xlu0 %2482 }
 0xef0   : > { %v2485_v36 = vmul.f32 0.03125, %v2483_v19  ;;  %v2480_v38 = vpop.xlane.xlu1 %2479 }
 0xef1   : > { %v2484_v21 = vmul.f32 0.03125, %v2480_v38 }
 0xef2   : > { %v2487_v23 = vadd.f32 1e-05, %v2485_v36 }
 0xef3   : > { %v2486_v24 = vadd.f32 1e-05, %v2484_v21 }
 0xef4   : > { %3430 = vrsqrt.f32 %v2487_v23 }
 0xef5   : > { %3432 = vrsqrt.f32 %v2486_v24 }
 0xefe   : > { %v3431_v25 = vpop.eup %3430 }
 0xeff   : > { %v3433_v27 = vpop.eup %3432  ;;  %v2491_v30 = vmul.f32 %v3431_v25, %v2475_v14 }
 0xf00   : > { %v2490_v32 = vmul.f32 %v3433_v27, %v2474_v20  ;;  %2513 = sbr.rel (%p2919_p3) target bundleno = 3847 (0xf07), region = 124 }
 0xf01   : > { %v2499_v28 = vmul.f32 %v2917_v26, %v2491_v30 }
 0xf02   : > { %v2498_v33 = vmul.f32 %v2917_v26, %v2490_v32 }
 0xf03   : > { %v2507_v34 = vadd.f32 %v2918_v31, %v2499_v28 }
 0xf04   : > { %v2506_v35 = vadd.f32 %v2918_v31, %v2498_v33 }
 0xf05   : > { %2509 = vst.msk [vmem:[#allocation2 + $0x8] sm:$0xff] %vm1033_vm1, %v2507_v34  ;;  %2515 = vst.msk [vmem:[%s4271_s11 + $0x8] sm:$0xff] (!%p2919_p3), %vm1033_vm1, %v2507_v34 }
 0xf06   : > { %2508 = vst.msk [vmem:[#allocation2] sm:$0xff] %vm1033_vm1, %v2506_v35  ;;  %2514 = vst.msk [vmem:[%s4271_s11] sm:$0xff] (!%p2919_p3), %vm1033_vm1, %v2506_v35 }
 0xf07 PF: > { %s4737_s20 = sld [smem:[#allocation23_spill]]  ;;  %s4738_s27 = sld [smem:[#allocation34_spill]] }
 0xf08   : > { %s4739_s30 = sld [smem:[#allocation27_spill]]  ;;  %s4740_s0 = sld [smem:[#allocation54_spill]] }
 0xf09   : > { %s2530_s10 = sshll.u32 %s4271_s11, 4  ;;  %s3729_s7 = smov [#allocation12]   ;;  %s4502_s10 = int_to_ptr.vmem [resolvable:$true] %s2530_s10 }
 0xf0a   : > { %s3584_s29 = scalar_lea.vmem %s4502_s10, 256  ;;  %s3588_s14 = sshll.u32 %s3729_s7, 4  ;;  %s3589_s14 = int_to_ptr.vmem [resolvable:$false] %s3588_s14 }
 0xf0b   : > { %p3585_p7 = scmp.ne.s32.totalorder %s4502_s10, %s3584_s29  ;;  %s3590_s8 = scalar_lea.vmem %s3589_s14, 512 }
 0xf0c   : > { %p3591_p8 = scmp.lt.s32.totalorder %s4502_s10, %s3589_s14  ;;  %p3592_p2 = scmp.lt.s32.totalorder %s3590_s8, %s3584_s29 }
 0xf0d   : > { %s2934_s3 = sshll.u32 %s4737_s20, 8  ;;  %s2517_s12 = scalar_lea.sflag [#allocation5], %s4738_s27 }
 0xf0e   : > { %s4741_s9 = smov %s4740_s0  ;;  %s4499_s26 = scalar_lea.hbm %s4740_s0, %s2934_s3 }
 0xf0f   : > { %p4742_p12 = scmp.ne.s32.totalorder %s4739_s30, 0  ;;  %p3593_p11 = por %p3592_p2, %p3591_p8 }
 0xf11   : > { %p3586_p13 = pnand %p3585_p7, %p4742_p12 }
 0xf13   : > { %p3587_p0 = pneg %p3586_p13 }
 0xf15   : > { %p3594_p6 = pnand %p3593_p11, %p3587_p0 }
 0xf17   : > { %3597 = shalt.err (!%p3594_p6)
}
 0xf18   : > { %s3598_s11 = scalar_lea.hbm %s4499_s26, 256  ;;  %s3602_s24 = scalar_lea.hbm %s4741_s9, 512 }
 0xf19   : > { %p3599_p5 = scmp.ne.s32.totalorder %s4499_s26, %s3598_s11  ;;  %p3603_p1 = scmp.lt.u32.totalorder %s4499_s26, %s4741_s9 }
 0xf1a   : > { %p3604_p10 = scmp.lt.u32.totalorder %s3602_s24, %s3598_s11  ;;  %p3606_p7 = scmp.lt.u32.totalorder %s3598_s11, %s4499_s26 }
 0xf1b   : > { %p3600_p4 = pnand %p3599_p5, %p4742_p12 }
 0xf1c   : > { %p3605_p3 = por %p3604_p10, %p3603_p1 }
 0xf1d   : > { %p3601_p9 = pneg %p3600_p4 }
 0xf1e   : > { %p3607_p13 = por %p3606_p7, %p3605_p3 }
 0xf20   : > { %p3608_p0 = pnand %p3607_p13, %p3601_p9 }
 0xf22   : > { %3611 = shalt.err (!%p3608_p0)
}
 0xf23   : > { %s3730_s6 = smov 128  }
 0xf24   : > { %3243 = dma.vmem_to_hbm [thread:$0]  (%p4742_p12), %s4502_s10, 256, %s4499_s26, %s2517_s12, %s3730_s6, %s3730_s6, %s3726_s4  }
 0xf25 PF: > { %s4743_s21 = sld [smem:[#allocation26_spill]]  ;;  %s4744_s19 = sld [smem:[#allocation19_spill]] }
 0xf26   : > { %s4745_s22 = sld [smem:[#allocation28_spill]] }
 0xf2b   : > { %p3266_p8 = scmp.ge.s32.totalorder %s4743_s21, 2  ;;  %s2545_s13 = sand.u32 1, %s4744_s19  }
 0xf2c   : > { %p4746_p2 = scmp.ne.s32.totalorder %s4745_s22, 0  ;;  %s2546_s25 = scalar_lea.sflag [#allocation5], %s2545_s13 }
 0xf2e   : > { %p3262_p11 = pnand %p3266_p8, %p4746_p2 }
 0xf30   : > { %3669 = dma.done.wait (!%p3262_p11), %s2546_s25, 256  }
 0xf31   : > { %3671 = vsyncadd (!%p3262_p11), %s2546_s25, 4294967040  ;;  %s41_s3 = sadd.s32 1, %s4743_s21   ;;  %s4747_s0 = sld [smem:[#allocation17_spill]] }
 0xf32   : > { %p38_p6 = scmp.ge.s32.totalorder %s41_s3, 6   ;;  %s4748_s30 = sld [smem:[#allocation18_spill]] }
 0xf33   : > { %s4749_s20 = sld [smem:[#allocation32_spill]]  ;;  %s4750_s21 = sld [smem:[#allocation20_spill]] }
 0xf34   : > { %s4751_s1 = sld [smem:[#allocation21_spill]]  ;;  %s4752_s22 = sld [smem:[#allocation33_spill]] }
 0xf35   : > { %s4753_s2 = sld [smem:[#allocation24_spill]]  ;;  %s4754_s23 = sld [smem:[#allocation25_spill]] }
 0xf36   : > { %s4755_s24 = sld [smem:[#allocation29_spill]]  ;;  %s4756_s25 = sld [smem:[#allocation31_spill]] }
 0xf37   :  { %40 = sbr.rel (!%p38_p6) target bundleno = 34 (0x22), region = 239 }
 0xf3e   :  { %2551 = vsyncpa [#allocation4], 1 }
 0xf3f   :  { %2553 = vsyncpa [#allocation4 + $0x1], 1 }
 0xf40   :  { %2554 = vsyncpa [#allocation7], 1 }
 0xf41   :  { %2556 = vsyncpa [#allocation7 + $0x1], 1 }
 0xf42   :  { %2557 = vsyncpa [#allocation10], 1 }
 0xf43   :  { %2559 = vsyncpa [#allocation10 + $0x1], 1 }
 0xf44   :  { %2560 = vsyncpa [#allocation5], 1 }
 0xf45   :  { %2562 = vsyncpa [#allocation5 + $0x1], 1 }

</bundles_post_ra>
